<compile_context>
chip_gen: v7x
topology: tpu7x:2x2x1
jax: 0.10.0
libtpu: 0.0.40
codegen_flags: <defaults>
</compile_context>

<pallas_src>
import functools

import jax
import jax.numpy as jnp
from jax.experimental import pallas as pl
from jax.experimental.pallas import tpu as pltpu


def mha_kernel(x_ref, wqkv_ref, wproj_ref, bproj_ref, o_ref,
               q_scr, k_scr, v_scr, *, num_heads, block_q):
    """One grid step = one (batch element, query tile).

    x_ref:     (1, N, C)   bf16  full sequence (constant across qi -> one DMA per b)
    wqkv_ref:  (C, 3C)     bf16  [W_q*scale ; W_k ; W_v]^T (fused, pre-transposed)
    wproj_ref: (C, C)      bf16  W_proj^T
    bproj_ref: (1, C)      f32   proj bias
    o_ref:     (1, bq, C)
    q_scr/k_scr/v_scr: (H, N, hd) bf16 persistent head-major scratch (per batch).
    """
    qi = pl.program_id(1)
    x = x_ref[0]                              # (N, C) bf16
    n, C = x.shape
    hd = C // num_heads

    # --- Per-batch precompute: fused QKV projection + head-major relayout. ---
    @pl.when(qi == 0)
    def _precompute_qkv():
        # One (N, C) @ (C, 3C) MXU pass per batch element (3C-wide output fills
        # the MXU output lanes better than separate C / 2C passes).
        qkv = jnp.dot(x, wqkv_ref[...], preferred_element_type=jnp.float32)  # (N, 3C)

        def head_major(m):                    # (N, C) -> (H, N, hd)
            return jnp.swapaxes(m.reshape(n, num_heads, hd), 0, 1)

        q_scr[...] = head_major(qkv[:, :C]).astype(jnp.bfloat16)
        k_scr[...] = head_major(qkv[:, C:2 * C]).astype(jnp.bfloat16)
        v_scr[...] = head_major(qkv[:, 2 * C:]).astype(jnp.bfloat16)

    # --- Per-tile attention (no projection / relayout work repeated here). ---
    q0 = pl.multiple_of(qi * block_q, block_q)
    qh = q_scr[:, pl.ds(q0, block_q), :]                       # (H, bq, hd) bf16

    # Attention logits (scale already folded into the q weight columns), f32.
    s = jnp.einsum('hqd,hkd->hqk', qh, k_scr[...],
                   preferred_element_type=jnp.float32)         # (H, bq, N)
    s = s - jnp.max(s, axis=-1, keepdims=True)
    p = jnp.exp(s)                                             # unnormalized, f32
    denom = jnp.sum(p, axis=-1, keepdims=True)                 # (H, bq, 1)

    # Unnormalized context; normalization deferred to the (H, bq, hd) context
    # (N/hd x less VPU work than scaling the (H, bq, N) probabilities).
    ctx = jnp.einsum('hqk,hkd->hqd', p.astype(jnp.bfloat16), v_scr[...],
                     preferred_element_type=jnp.float32)       # (H, bq, hd)
    ctx = ctx * pl.reciprocal(denom, approx=True)
    ctx = jnp.swapaxes(ctx, 0, 1).reshape(block_q, C)          # (bq, C)

    # Output projection + bias; single lane-dense full-row store.
    y = jnp.dot(ctx.astype(jnp.bfloat16), wproj_ref[...],
                preferred_element_type=jnp.float32) + bproj_ref[...]
    o_ref[0] = y.astype(o_ref.dtype)


def _vmem_capacity_bytes():
    """Generation-aware VMEM capacity; falls back to the smallest (v7x: 64 MiB)."""
    try:
        cap = getattr(pltpu.get_tpu_info(), "vmem_capacity_bytes", None)
        if cap:
            return int(cap)
    except Exception:
        pass
    return 64 * 1024 * 1024


def _choose_block_q(n, num_heads, vmem_budget):
    """Largest sublane-aligned query tile (<= 256 rows) whose f32 score + prob
    tiles stay within ~1/3 of the VMEM budget."""
    def fits(bq):
        return 2 * num_heads * bq * n * 4 <= vmem_budget // 3

    if n <= 8:
        return n
    cands = [d for d in range(min(256, n), 7, -1) if n % d == 0 and d % 8 == 0]
    for d in cands:
        if fits(d):
            return d
    if cands:
        return cands[-1]
    # No sublane-aligned divisor of N: fall back to a single full-sequence tile.
    return n


def multi_head_attention(x, wqkv, wproj, bproj, *, num_heads, block_q=None):
    """Forward pass of the PyTorch MultiHeadAttention module.

    x:     (B, N, C)
    wqkv:  (3C, C)  == nn.Linear(dim, 3*dim, bias=False).weight
    wproj: (C, C)   == nn.Linear(dim, dim).weight
    bproj: (C,)     == nn.Linear(dim, dim).bias
    """
    B, N, C = x.shape
    assert C % num_heads == 0
    hd = C // num_heads
    scale = hd ** (-0.5)

    # Generation-aware VMEM budget (leave headroom for compiler scratch).
    vmem_cap = _vmem_capacity_bytes()
    vmem_budget = int(vmem_cap * 7 // 8)

    if block_q is None:
        block_q = _choose_block_q(N, num_heads, vmem_budget)
    if N % block_q != 0:
        block_q = _choose_block_q(N, num_heads, vmem_budget)
    nq_tiles = N // block_q

    # One-time wrapper-side weight prep: fuse q/k/v weights into one (C, 3C)
    # pre-transposed matrix with the attention scale folded into the q columns;
    # cast all MXU operands to bf16.
    wqkv_t = jnp.concatenate([wqkv[:C] * scale, wqkv[C:]], axis=0).T.astype(jnp.bfloat16)  # (C, 3C)
    wproj_t = wproj.T.astype(jnp.bfloat16)               # (C, C)
    bias2d = bproj.reshape(1, C).astype(jnp.float32)
    x_bf16 = x.astype(jnp.bfloat16)

    # Explicit VMEM budget from the actual tile sizes (+ headroom), clamped to
    # the generation's capacity.  (Weight BlockSpecs are grid-constant; they are
    # still double-buffered by default, which the estimate accounts for.)
    itemsize = jnp.dtype(x.dtype).itemsize
    tile_bytes = (
        2 * N * C * 2                       # double-buffered x block (bf16)
        + 2 * block_q * C * itemsize        # double-buffered output block
        + 2 * (4 * C * C) * 2 + 2 * C * 4   # weights (bf16, double-buffered) + bias
        + 3 * N * C * 2                     # persistent q/k/v head-major scratch (bf16)
        + 3 * N * C * 4                     # f32 QKV intermediate (per-batch precompute)
        + 2 * num_heads * block_q * N * 4   # scores + probs (f32)
        + 2 * block_q * C * 4               # ctx / y intermediates (f32)
    )
    vmem_limit = int(min(max(int(1.5 * tile_bytes), 32 * 1024 * 1024), vmem_budget))

    # Advisory cost estimate for the XLA scheduler.
    flops = B * (2 * N * C * (3 * C)        # fused QKV projection
                 + 4 * N * N * C            # attention scores + context
                 + 2 * N * C * C)           # output projection
    transcendentals = B * num_heads * N * N
    bytes_accessed = (B * N * C * (2 + itemsize)          # x in (bf16) + out
                      + (3 * C * C + C * C) * 2 + C * 4)  # weights + bias
    cost = pl.CostEstimate(flops=int(flops),
                           transcendentals=int(transcendentals),
                           bytes_accessed=int(bytes_accessed))

    kernel = functools.partial(mha_kernel, num_heads=num_heads, block_q=block_q)
    return pl.pallas_call(
        kernel,
        out_shape=jax.ShapeDtypeStruct((B, N, C), x.dtype),
        grid_spec=pltpu.PrefetchScalarGridSpec(
            num_scalar_prefetch=0,
            grid=(B, nq_tiles),
            in_specs=[
                pl.BlockSpec((1, N, C), lambda b, qi: (b, 0, 0)),     # x (full seq, fetched once per b)
                pl.BlockSpec((C, 3 * C), lambda b, qi: (0, 0)),       # fused W_qkv^T (q cols pre-scaled)
                pl.BlockSpec((C, C), lambda b, qi: (0, 0)),           # W_proj^T
                pl.BlockSpec((1, C), lambda b, qi: (0, 0)),           # proj bias
            ],
            out_specs=pl.BlockSpec((1, block_q, C), lambda b, qi: (b, qi, 0)),
            scratch_shapes=[
                pltpu.VMEM((num_heads, N, hd), jnp.bfloat16),  # q head-major (per batch)
                pltpu.VMEM((num_heads, N, hd), jnp.bfloat16),  # k head-major (per batch)
                pltpu.VMEM((num_heads, N, hd), jnp.bfloat16),  # v head-major (per batch)
            ],
        ),
        compiler_params=pltpu.CompilerParams(
            # qi must be "arbitrary": the per-batch QKV scratch is reused
            # sequentially across query tiles of the same batch element.
            dimension_semantics=("parallel", "arbitrary"),
            vmem_limit_bytes=vmem_limit,
        ),
        cost_estimate=cost,
    )(x_bf16, wqkv_t, wproj_t, bias2d)


def mha_reference(x, wqkv, wproj, bproj, *, num_heads):
    """Pure-JAX (f32) port of the PyTorch forward, for verification."""
    B, N, C = x.shape
    hd = C // num_heads
    scale = hd ** (-0.5)
    qkv = (x @ wqkv.T).reshape(B, N, 3, num_heads, hd).transpose(2, 0, 3, 1, 4)
    q, k, v = qkv[0], qkv[1], qkv[2]
    attn = (q @ jnp.swapaxes(k, -2, -1)) * scale
    attn = jax.nn.softmax(attn, axis=-1)
    out = jnp.swapaxes(attn @ v, 1, 2).reshape(B, N, C)
    return out @ wproj.T + bproj


if __name__ == "__main__":
    # dim=128 (multiple of 128 -> lane-dense output stores), num_heads=8.
    B, N, C, H = 2, 16, 128, 8

    key = jax.random.PRNGKey(0)
    kx, kqkv, kproj, kbias = jax.random.split(key, 4)

    x = jax.random.normal(kx, (B, N, C), dtype=jnp.float32)
    # Deterministic synthetic parameters (same shapes as the nn.Module).
    wqkv = jax.random.normal(kqkv, (3 * C, C), dtype=jnp.float32) * 0.05
    wproj = jax.random.normal(kproj, (C, C), dtype=jnp.float32) * 0.05
    bproj = jax.random.normal(kbias, (C,), dtype=jnp.float32) * 0.05

    out = multi_head_attention(x, wqkv, wproj, bproj, num_heads=H)
    out = jax.block_until_ready(out)

    ref = mha_reference(x, wqkv, wproj, bproj, num_heads=H)
    assert out.shape == (B, N, C)
    # bf16 matmul inputs + approx reciprocal -> looser tolerance than pure f32.
    max_err = float(jnp.max(jnp.abs(out - ref)))
    assert jnp.allclose(out, ref, rtol=2e-2, atol=2e-2), (
        f"mismatch vs reference (max |err| = {max_err})")

    print("KERNEL_OK")
</pallas_src>

<mosaic_0001>
module attributes {stable_mosaic.version = 11 : i64} {
  func.func @mha_kernel(%arg0: i32, %arg1: i32, %arg2: memref<1x16x128xbf16, #tpu.memory_space<vmem>>, %arg3: memref<128x384xbf16, #tpu.memory_space<vmem>>, %arg4: memref<128x128xbf16, #tpu.memory_space<vmem>>, %arg5: memref<1x128xf32, #tpu.memory_space<vmem>>, %arg6: memref<1x16x128xf32, #tpu.memory_space<vmem>>, %arg7: memref<8x16x16xbf16, #tpu.memory_space<vmem>>, %arg8: memref<8x16x16xbf16, #tpu.memory_space<vmem>>, %arg9: memref<8x16x16xbf16, #tpu.memory_space<vmem>>) attributes {dimension_semantics = [#tpu.dimension_semantics<parallel>, #tpu.dimension_semantics<arbitrary>], iteration_bounds = array<i64: 2, 1>, scalar_prefetch = 0 : i64, scratch_operands = 3 : i64, tpu.core_type = #tpu.core_type<tc>, window_params = [{transform_indices = @transform_0, window_bounds = array<i64: 1, 16, 128>}, {pipeline_mode = #tpu.pipeline_mode<synchronous>, transform_indices = @transform_1, window_bounds = array<i64: 128, 384>}, {pipeline_mode = #tpu.pipeline_mode<synchronous>, transform_indices = @transform_2, window_bounds = array<i64: 128, 128>}, {pipeline_mode = #tpu.pipeline_mode<synchronous>, transform_indices = @transform_3, window_bounds = array<i64: 1, 128>}, {transform_indices = @transform_4, window_bounds = array<i64: 1, 16, 128>}]} {
    %c0 = arith.constant 0 : index
    %c0_0 = arith.constant 0 : index
    %c0_1 = arith.constant 0 : index
    %0 = vector.load %arg2[%c0, %c0_0, %c0_1] : memref<1x16x128xbf16, #tpu.memory_space<vmem>>, vector<1x16x128xbf16>
    %1 = vector.shape_cast %0 : vector<1x16x128xbf16> to vector<16x128xbf16>
    %c0_i32 = arith.constant 0 : i32
    %2 = arith.cmpi eq, %arg1, %c0_i32 : i32
    %3 = arith.extui %2 : i1 to i32
    %c0_i32_2 = arith.constant 0 : i32
    %4 = arith.cmpi ne, %3, %c0_i32_2 : i32
    scf.if %4 {
      %c0_22 = arith.constant 0 : index
      %c0_23 = arith.constant 0 : index
      %35 = vector.load %arg3[%c0_22, %c0_23] : memref<128x384xbf16, #tpu.memory_space<vmem>>, vector<128x384xbf16>
      %cst_24 = arith.constant dense<0.000000e+00> : vector<16x384xf32>
      %36 = tpu.matmul %1, %35, %cst_24 {dimension_numbers = #tpu.dot_dimension_numbers<[1], [0], [0], [1], [0, 0, 1, 1], [], []>} : vector<16x128xbf16>, vector<128x384xbf16>, vector<16x384xf32> -> vector<16x384xf32>
      %37 = vector.extract_strided_slice %36 {offsets = [0, 0], sizes = [16, 128], strides = [1, 1]} : vector<16x384xf32> to vector<16x128xf32>
      %38 = vector.shape_cast %37 : vector<16x128xf32> to vector<16x8x16xf32>
      %39 = tpu.transpose %38, [1, 0, 2] : vector<16x8x16xf32> -> vector<8x16x16xf32>
      %40 = arith.truncf %39 : vector<8x16x16xf32> to vector<8x16x16xbf16>
      %c0_25 = arith.constant 0 : index
      %c0_26 = arith.constant 0 : index
      %c0_27 = arith.constant 0 : index
      %41 = vector.load %arg7[%c0_25, %c0_26, %c0_27] : memref<8x16x16xbf16, #tpu.memory_space<vmem>>, vector<8x16x16xbf16>
      tpu.vector_store %arg7[%c0_25, %c0_26, %c0_27], %40 {strides = array<i32>} : memref<8x16x16xbf16, #tpu.memory_space<vmem>>, vector<8x16x16xbf16>,
      %42 = vector.extract_strided_slice %36 {offsets = [0, 128], sizes = [16, 128], strides = [1, 1]} : vector<16x384xf32> to vector<16x128xf32>
      %43 = vector.shape_cast %42 : vector<16x128xf32> to vector<16x8x16xf32>
      %44 = tpu.transpose %43, [1, 0, 2] : vector<16x8x16xf32> -> vector<8x16x16xf32>
      %45 = arith.truncf %44 : vector<8x16x16xf32> to vector<8x16x16xbf16>
      %c0_28 = arith.constant 0 : index
      %c0_29 = arith.constant 0 : index
      %c0_30 = arith.constant 0 : index
      %46 = vector.load %arg8[%c0_28, %c0_29, %c0_30] : memref<8x16x16xbf16, #tpu.memory_space<vmem>>, vector<8x16x16xbf16>
      tpu.vector_store %arg8[%c0_28, %c0_29, %c0_30], %45 {strides = array<i32>} : memref<8x16x16xbf16, #tpu.memory_space<vmem>>, vector<8x16x16xbf16>,
      %47 = vector.extract_strided_slice %36 {offsets = [0, 256], sizes = [16, 128], strides = [1, 1]} : vector<16x384xf32> to vector<16x128xf32>
      %48 = vector.shape_cast %47 : vector<16x128xf32> to vector<16x8x16xf32>
      %49 = tpu.transpose %48, [1, 0, 2] : vector<16x8x16xf32> -> vector<8x16x16xf32>
      %50 = arith.truncf %49 : vector<8x16x16xf32> to vector<8x16x16xbf16>
      %c0_31 = arith.constant 0 : index
      %c0_32 = arith.constant 0 : index
      %c0_33 = arith.constant 0 : index
      %51 = vector.load %arg9[%c0_31, %c0_32, %c0_33] : memref<8x16x16xbf16, #tpu.memory_space<vmem>>, vector<8x16x16xbf16>
      tpu.vector_store %arg9[%c0_31, %c0_32, %c0_33], %50 {strides = array<i32>} : memref<8x16x16xbf16, #tpu.memory_space<vmem>>, vector<8x16x16xbf16>,
    } else {
    }
    %c16_i32 = arith.constant 16 : i32
    %5 = arith.muli %arg1, %c16_i32 : i32
    %6 = tpu.assume_multiple %5, 16 : i32
    %c0_3 = arith.constant 0 : index
    %7 = arith.index_cast %6 : i32 to index
    %c0_4 = arith.constant 0 : index
    %8 = vector.load %arg7[%c0_3, %7, %c0_4] : memref<8x16x16xbf16, #tpu.memory_space<vmem>>, vector<8x16x16xbf16>
    %c0_5 = arith.constant 0 : index
    %c0_6 = arith.constant 0 : index
    %c0_7 = arith.constant 0 : index
    %9 = vector.load %arg8[%c0_5, %c0_6, %c0_7] : memref<8x16x16xbf16, #tpu.memory_space<vmem>>, vector<8x16x16xbf16>
    "tpu.trace_start"() <{level = 10 : i32, message = "hqd,hkd->hqk"}> : () -> ()
    %cst = arith.constant dense<0.000000e+00> : vector<8x16x16xf32>
    %10 = tpu.matmul %8, %9, %cst {dimension_numbers = #tpu.dot_dimension_numbers<[2], [2], [1], [1], [0, 0, 0, 1, 1, 1], [0], [0]>} : vector<8x16x16xbf16>, vector<8x16x16xbf16>, vector<8x16x16xf32> -> vector<8x16x16xf32>
    "tpu.trace_stop"() : () -> ()
    %cst_8 = arith.constant dense<0xFF800000> : vector<8x16xf32>
    %11 = vector.multi_reduction <maximumf>, %10, %cst_8 [2] : vector<8x16x16xf32> to vector<8x16xf32>
    %12 = vector.shape_cast %11 : vector<8x16xf32> to vector<8x16x1xf32>
    %13 = vector.broadcast %12 : vector<8x16x1xf32> to vector<8x16x16xf32>
    %14 = arith.subf %10, %13 : vector<8x16x16xf32>
    %15 = math.exp %14 : vector<8x16x16xf32>
    %cst_9 = arith.constant dense<0.000000e+00> : vector<8x16xf32>
    %16 = vector.multi_reduction <add>, %15, %cst_9 [2] : vector<8x16x16xf32> to vector<8x16xf32>
    %17 = vector.shape_cast %16 : vector<8x16xf32> to vector<8x16x1xf32>
    %18 = arith.truncf %15 : vector<8x16x16xf32> to vector<8x16x16xbf16>
    %c0_10 = arith.constant 0 : index
    %c0_11 = arith.constant 0 : index
    %c0_12 = arith.constant 0 : index
    %19 = vector.load %arg9[%c0_10, %c0_11, %c0_12] : memref<8x16x16xbf16, #tpu.memory_space<vmem>>, vector<8x16x16xbf16>
    "tpu.trace_start"() <{level = 10 : i32, message = "hqk,hkd->hqd"}> : () -> ()
    %cst_13 = arith.constant dense<0.000000e+00> : vector<8x16x16xf32>
    %20 = tpu.matmul %18, %19, %cst_13 {dimension_numbers = #tpu.dot_dimension_numbers<[2], [1], [1], [2], [0, 0, 0, 1, 1, 2], [0], [0]>} : vector<8x16x16xbf16>, vector<8x16x16xbf16>, vector<8x16x16xf32> -> vector<8x16x16xf32>
    "tpu.trace_stop"() : () -> ()
    %21 = tpu.reciprocal %17 {approx = true} : vector<8x16x1xf32> -> vector<8x16x1xf32>
    %22 = vector.broadcast %21 : vector<8x16x1xf32> to vector<8x16x16xf32>
    %23 = arith.mulf %20, %22 : vector<8x16x16xf32>
    %24 = tpu.transpose %23, [1, 0, 2] : vector<8x16x16xf32> -> vector<16x8x16xf32>
    %25 = vector.shape_cast %24 : vector<16x8x16xf32> to vector<16x128xf32>
    %26 = arith.truncf %25 : vector<16x128xf32> to vector<16x128xbf16>
    %c0_14 = arith.constant 0 : index
    %c0_15 = arith.constant 0 : index
    %27 = vector.load %arg4[%c0_14, %c0_15] : memref<128x128xbf16, #tpu.memory_space<vmem>>, vector<128x128xbf16>
    %cst_16 = arith.constant dense<0.000000e+00> : vector<16x128xf32>
    %28 = tpu.matmul %26, %27, %cst_16 {dimension_numbers = #tpu.dot_dimension_numbers<[1], [0], [0], [1], [0, 0, 1, 1], [], []>} : vector<16x128xbf16>, vector<128x128xbf16>, vector<16x128xf32> -> vector<16x128xf32>
    %c0_17 = arith.constant 0 : index
    %c0_18 = arith.constant 0 : index
    %29 = vector.load %arg5[%c0_17, %c0_18] : memref<1x128xf32, #tpu.memory_space<vmem>>, vector<1x128xf32>
    %30 = vector.broadcast %29 : vector<1x128xf32> to vector<16x128xf32>
    %31 = arith.addf %28, %30 : vector<16x128xf32>
    %c0_19 = arith.constant 0 : index
    %c0_20 = arith.constant 0 : index
    %c0_21 = arith.constant 0 : index
    %32 = vector.load %arg6[%c0_19, %c0_20, %c0_21] : memref<1x16x128xf32, #tpu.memory_space<vmem>>, vector<1x16x128xf32>
    %33 = vector.shape_cast %32 : vector<1x16x128xf32> to vector<16x128xf32>
    %34 = vector.shape_cast %31 : vector<16x128xf32> to vector<1x16x128xf32>
    tpu.vector_store %arg6[%c0_19, %c0_20, %c0_21], %34 {strides = array<i32>} : memref<1x16x128xf32, #tpu.memory_space<vmem>>, vector<1x16x128xf32>,
    return
  }
  func.func @transform_0(%arg0: i32, %arg1: i32) -> (i32, i32, i32) {
    %c0_i32 = arith.constant 0 : i32
    %c0_i32_0 = arith.constant 0 : i32
    %c0_i32_1 = arith.constant 0 : i32
    return %arg0, %c0_i32, %c0_i32_0 : i32, i32, i32
  }
  func.func @transform_1(%arg0: i32, %arg1: i32) -> (i32, i32) {
    %c0_i32 = arith.constant 0 : i32
    %c0_i32_0 = arith.constant 0 : i32
    %c0_i32_1 = arith.constant 0 : i32
    return %c0_i32, %c0_i32_0 : i32, i32
  }
  func.func @transform_2(%arg0: i32, %arg1: i32) -> (i32, i32) {
    %c0_i32 = arith.constant 0 : i32
    %c0_i32_0 = arith.constant 0 : i32
    %c0_i32_1 = arith.constant 0 : i32
    return %c0_i32, %c0_i32_0 : i32, i32
  }
  func.func @transform_3(%arg0: i32, %arg1: i32) -> (i32, i32) {
    %c0_i32 = arith.constant 0 : i32
    %c0_i32_0 = arith.constant 0 : i32
    %c0_i32_1 = arith.constant 0 : i32
    return %c0_i32, %c0_i32_0 : i32, i32
  }
  func.func @transform_4(%arg0: i32, %arg1: i32) -> (i32, i32, i32) {
    %c0_i32 = arith.constant 0 : i32
    %c0_i32_0 = arith.constant 0 : i32
    return %arg0, %arg1, %c0_i32 : i32, i32, i32
  }
}

</mosaic_0001>

<bundles_post_ra>
// kernel: tpu_custom_call.1
= control target key start
LH: loop header
LB: loop body
LE: loop exit
PB: predicated region body
PF: predicated region fallthrough
CT: control target
= control target key end

     0   :  { %9 = vsyncpa [#allocation6], 0  ;;  %s5900_s0 = inlined_call_operand.hbm [shape: bf16[2,16,128], index: 0, kind: input, shape index: {}]   ;;  %s5901_s1 = inlined_call_operand.hbm [shape: bf16[128,384], index: 1, kind: input, shape index: {}]   ;;  %s5902_s2 = inlined_call_operand.hbm [shape: bf16[128,128], index: 2, kind: input, shape index: {}]   ;;  %s5903_s3 = inlined_call_operand.vmem [shape: f32[1,128], index: 3, kind: input, shape index: {}]   ;;  %s5904_s4 = inlined_call_operand.hbm [shape: f32[2,16,128], index: 4, kind: output, shape index: {}]  }
   0x1   :  { %11 = vsyncpa [#allocation6 + $0x1], 0 }
   0x2   :  { %12 = vsyncpa [#allocation9], 0 }
   0x3   :  { %13 = vsyncpa [#allocation7], 0 }
   0x4   :  { %15 = vsyncpa [#allocation7 + $0x1], 0  ;;  %s4911_s15 = smov 0   ;;  %s4913_s16 = smov 0  }
   0x5   :  { %s4915_s17 = smov 0   ;;  %s4917_s18 = smov 0  }
   0x6   :  { %s4919_s19 = smov 0   ;;  %s4921_s20 = smov 0  }
   0x7 LB: > { %s4128_s21 = sadd.s32 4294967295, %s4862_s20   ;;  %s4129_s22 = sadd.s32 4294967294, %s4862_s20   ;;  %s4862_s20 = sphi %s4921_s20, %s21_s20   ;;  %s4858_s19 = sphi %s4919_s19, %s5926_s19   ;;  %s4854_s18 = sphi %s4917_s18, %s5925_s18   ;;  %s4850_s17 = sphi %s4915_s17, %s5924_s17   ;;  %s4846_s16 = sphi %s4913_s16, %s5923_s16   ;;  %s4842_s15 = sphi %s4911_s15, %s5922_s15  }
   0x8   : > { %p53_p0 = scmp.ne.s32.totalorder %s4846_s16, %s4842_s15  ;;  %p4945_p1 = scmp.eq.s32.totalorder %s4128_s21, 0 }
   0x9   : > { %p4949_p2 = scmp.eq.s32.totalorder %s4128_s21, 1  ;;  %p148_p3 = scmp.eq.s32.totalorder %s4129_s22, 1 }
   0xa   : > { %s5909_s23 = scalar_select %p4945_p1, 1, 0 }
   0xb   : > { %p4955_p4 = por %p4945_p1, %p53_p0  ;;  %p4130_p5 = scmp.ge.s32.totalorder %s4862_s20, 1 }
   0xc   : > { %p4960_p6 = por %p148_p3, %p53_p0  ;;  %p155_p7 = scmp.lt.s32.totalorder %s4862_s20, 3 }
   0xd   : > { %s5911_s25 = scalar_select %p4955_p4, 1, 0 }
   0xe   : > { %s5912_s26 = scalar_select %p4960_p6, 1, 0 }
   0xf   : > { %p4965_p8 = pnand %p4130_p5, %p155_p7  ;;  %s4864_s28 = smov [#allocation8]  }
  0x10   : > { %s167_s29 = sshll.u32 %s4864_s28, 4  ;;  %s4865_s5 = smov [#allocation10]   ;;  %s4969_s29 = int_to_ptr.vmem [resolvable:$true] %s167_s29 }
  0x11   : > { %p4461_p9 = pneg %p4965_p8  ;;  %s180_s6 = sshll.u32 %s4865_s5, 4  ;;  %s4980_s6 = int_to_ptr.vmem [resolvable:$true] %s180_s6 }
  0x12   : > { %s4690_s9 = scalar_lea.hbm %s5901_s1, 3072 }
  0x13   : > { %p4976_p11 = pnand %p4461_p9, %p4945_p1  ;;  %p4691_p12 = scmp.ne.s32.totalorder %s5901_s1, %s4690_s9 }
  0x14   : > { %p4697_p5 = scmp.lt.u32.totalorder %s4690_s9, %s5901_s1 }
  0x15   : > { %p4692_p13 = pneg %p4976_p11 }
  0x17   : > { %p4693_p0 = pnand %p4692_p13, %p4691_p12 }
  0x19   : > { %p4694_p3 = pneg %p4693_p0 }
  0x1b   : > { %p4699_p7 = pnand %p4697_p5, %p4694_p3 }
  0x1d   : > { %4702 = shalt.err (!%p4699_p7)
}
  0x1e   : > { %s4703_s14 = scalar_lea.vmem %s4969_s29, 3072  ;;  %p4711_p1 = scmp.lt.s32.totalorder %s4969_s29, %s4969_s29 }
  0x1f   : > { %p4704_p9 = scmp.ne.s32.totalorder %s4969_s29, %s4703_s14  ;;  %p4712_p12 = scmp.lt.s32.totalorder %s4703_s14, %s4703_s14 }
  0x21   : > { %p4706_p10 = pnand %p4704_p9, %p4692_p13  ;;  %p4713_p0 = por %p4712_p12, %p4711_p1 }
  0x23   : > { %p4707_p6 = pneg %p4706_p10 }
  0x25   : > { %p4714_p4 = pnand %p4713_p0, %p4707_p6 }
  0x27   : > { %4717 = shalt.err (!%p4714_p4)
}
  0x28   : > { %s4866_s21 = smov 192   ;;  %s4867_s22 = smov 12  }
  0x29   : > { %4464 = dma.hbm_to_vmem [thread:$0]  (!%p4976_p11), %s5901_s1, 3072, %s4969_s29, [#allocation9], %s4866_s21, %s4866_s21, %s4867_s22  }
  0x2a   : > { %s4718_s9 = scalar_lea.hbm %s5902_s2, 1024 }
  0x2b   : > { %p4719_p1 = scmp.ne.s32.totalorder %s5902_s2, %s4718_s9  ;;  %p4725_p10 = scmp.lt.u32.totalorder %s4718_s9, %s5902_s2 }
  0x2d   : > { %p4721_p4 = pnand %p4719_p1, %p4692_p13 }
  0x2f   : > { %p4722_p6 = pneg %p4721_p4 }
  0x31   : > { %p4727_p3 = pnand %p4725_p10, %p4722_p6 }
  0x33   : > { %4730 = shalt.err (!%p4727_p3)
}
  0x34   : > { %s4731_s29 = scalar_lea.vmem %s4980_s6, 1024  ;;  %p4739_p12 = scmp.lt.s32.totalorder %s4980_s6, %s4980_s6 }
  0x35   : > { %p4732_p5 = scmp.ne.s32.totalorder %s4980_s6, %s4731_s29  ;;  %p4740_p0 = scmp.lt.s32.totalorder %s4731_s29, %s4731_s29 }
  0x37   : > { %p4734_p7 = pnand %p4732_p5, %p4692_p13  ;;  %p4741_p1 = por %p4740_p0, %p4739_p12 }
  0x39   : > { %p4735_p9 = pneg %p4734_p7 }
  0x3b   : > { %p4742_p4 = pnand %p4741_p1, %p4735_p9 }
  0x3d   : > { %4745 = shalt.err (!%p4742_p4)
}
  0x3e   : > { %s4868_s14 = smov 64   ;;  %s4869_s21 = smov 4  }
  0x3f   : > { %4467 = dma.hbm_to_vmem [thread:$0]  (!%p4976_p11), %s5902_s2, 1024, %s4980_s6, [#allocation9], %s4868_s14, %s4868_s14, %s4869_s21  }
  0x40   : > { %s33_s5 = sadd.s32 1, %s4858_s19  ;;  %s40_s7 = sadd.s32 1, %s4850_s17 }
  0x41   : > { %p35_p13 = scmp.ge.s32.totalorder %s33_s5, 2  ;;  %p47_p6 = scmp.ne.s32.totalorder %s4850_s17, %s4846_s16 }
  0x42   : > { %p48_p10 = scmp.eq.s32.totalorder %s4862_s20, 0  ;;  %p4478_p3 = scmp.lt.s32.totalorder %s4862_s20, 2 }
  0x43   : > { %s5928_s5 = smov (%p35_p13, %s33_s5), 0  ;;  %p5047_p7 = por %p4949_p2, %p47_p6 }
  0x44   : > { %p49_p5 = por %p48_p10, %p47_p6  ;;  %s37_s8 = ssub.s32 %s4858_s19, %s5928_s5 }
  0x45   : > { %s5915_s30 = scalar_select %p5047_p7, 1, 0 }
  0x46   : > { %s197_s9 = sand.u32 1, %s4850_s17   ;;  %p38_p9 = scmp.eq.s32.totalorder %s37_s8, 0 }
  0x47   : > { %s4134_s6 = sshll.u32 %s197_s9, 3  ;;  %s4261_s10 = sshll.u32 %s4858_s19, 7 }
  0x48   : > { %s5056_s11 = scalar_select %p38_p9, %s4850_s17, %s40_s7  }
  0x49   : > { %s5061_s29 = scalar_lea.hbm %s5900_s0, %s4261_s10  ;;  %s201_s24 = scalar_lea.vmem [#allocation5], %s4134_s6 }
  0x4a   : > { %s208_s22 = sshll.u32 %s201_s24, 4  ;;  %p5065_p2 = pnand %p4478_p3, %p49_p5  ;;  %s5069_s22 = int_to_ptr.vmem [resolvable:$true] %s208_s22 }
  0x4b   : > { %s5071_s7 = scalar_lea.sflag [#allocation6], %s197_s9  ;;  %s4746_s8 = scalar_lea.hbm %s5061_s29, 128 }
  0x4c   : > { %p4747_p11 = scmp.ne.s32.totalorder %s5061_s29, %s4746_s8  ;;  %p4748_p12 = pneg %p5065_p2 }
  0x4d   : > { %s4751_s12 = scalar_lea.hbm %s5900_s0, 256  ;;  %p4752_p4 = scmp.lt.u32.totalorder %s5061_s29, %s5900_s0 }
  0x4e   : > { %p4749_p0 = pnand %p4748_p12, %p4747_p11  ;;  %p4753_p13 = scmp.lt.u32.totalorder %s4751_s12, %s4746_s8 }
  0x4f   : > { %p4755_p10 = scmp.lt.u32.totalorder %s4746_s8, %s5061_s29 }
  0x50   : > { %p4750_p1 = pneg %p4749_p0  ;;  %p4754_p6 = por %p4753_p13, %p4752_p4 }
  0x52   : > { %p4756_p3 = por %p4755_p10, %p4754_p6 }
  0x54   : > { %p4757_p5 = pnand %p4756_p3, %p4750_p1 }
  0x56   : > { %4760 = shalt.err (!%p4757_p5)
}
  0x57   : > { %s4761_s9 = scalar_lea.vmem %s5069_s22, 128  ;;  %s4870_s6 = smov [#allocation5]  }
  0x58   : > { %p4762_p9 = scmp.ne.s32.totalorder %s5069_s22, %s4761_s9  ;;  %s4766_s10 = sshll.u32 %s4870_s6, 4  ;;  %s4767_s10 = int_to_ptr.vmem [resolvable:$false] %s4766_s10 }
  0x59   : > { %s4768_s13 = scalar_lea.vmem %s4767_s10, 256  ;;  %p4769_p7 = scmp.lt.s32.totalorder %s5069_s22, %s4767_s10 }
  0x5a   : > { %p4764_p11 = pnand %p4762_p9, %p4748_p12  ;;  %p4770_p4 = scmp.lt.s32.totalorder %s4768_s13, %s4761_s9 }
  0x5c   : > { %p4765_p0 = pneg %p4764_p11  ;;  %p4771_p13 = por %p4770_p4, %p4769_p7 }
  0x5e   : > { %p4772_p6 = pnand %p4771_p13, %p4765_p0 }
  0x60   : > { %4775 = shalt.err (!%p4772_p6)
}
  0x61   : > { %4471 = dma.hbm_to_vmem [thread:$0]  (!%p5065_p2), %s5061_s29, 128, %s5069_s22, %s5071_s7, %s4868_s14, %s4868_s14, %s4869_s21  }
  0x62   : > { %220 = sbr.rel (%p4965_p8) target bundleno = 1587 (0x633), region = 36  ;;  %s5105_s8 = sand.u32 (!%p4965_p8), 1, %s4846_s16  }
  0x63   : > { %s4138_s12 = sshll.u32 (!%p4965_p8), %s5105_s8, 3  ;;  %s223_s24 = scalar_lea.sflag (!%p4965_p8), [#allocation6], %s5105_s8 }
  0x64   : > { %s5109_s9 = scalar_lea.vmem (!%p4965_p8), [#allocation5], %s4138_s12  ;;  %p5917_p7 = scmp.ne.s32.totalorder (!%p4965_p8), %s5911_s25, 0 }
  0x69   : > { %4829 = dma.done.wait (%p5917_p7), %s223_s24, 128  }
  0x6a   : > { %4831 = vsyncadd (%p5917_p7), %s223_s24, 4294967168  ;;  %p5918_p2 = scmp.ne.s32.totalorder %s5909_s23, 0 }
  0x6c   : > { %4833 = dma.done.wait (%p5918_p2), [#allocation9], 4096  }
  0x6d   : > { %4835 = vsyncadd (%p5918_p2), [#allocation9], 4294963200  ;;  %v4871_v0 = vmov 0   ;;  %v4872_v1 = vmov 0.0   ;;  %vm4873_vm0 = vmmov 0   ;;  %v4609_v23 = vld [vmem:[%s5109_s9] sm:$0xff]   ;;  %v566_v37 = vlaneseq }
  0x6e   : > { %465 = vmatprep.mubr.bf16.mxu0 %v4871_v0  ;;  %4313 = vmatprep.subr.bf16.mxu1 %v4872_v1  ;;  %v4585_v2 = vld [vmem:[#allocation8 + $0x4] ss:$12 sps:$4 sm:$0xff]   ;;  %v4587_v3 = vld [vmem:[#allocation8] ss:$12 sps:$4 sm:$0xff]   ;;  %v4588_v4 = vld [vmem:[#allocation8 + $0x1c] ss:$12 sps:$4 sm:$0xff]  }
  0x6f   : > { %4329 = vmatprep.mubr.msk.bf16.mxu1 %vm4873_vm0, %v4872_v1  ;;  %433 = vmatprep.subr.bf16.mxu0 %v4585_v2  ;;  %v4590_v5 = vld [vmem:[#allocation8 + $0x18] ss:$12 sps:$4 sm:$0xff]   ;;  %v4591_v6 = vld [vmem:[#allocation8 + $0x34] ss:$12 sps:$4 sm:$0xff]   ;;  %v4593_v7 = vld [vmem:[#allocation8 + $0x30] ss:$12 sps:$4 sm:$0xff]  }
  0x70   : > { %434 = vmatpush1.bf16.msra.mxu0 %v4587_v3  ;;  %v4594_v8 = vld [vmem:[#allocation8 + $0x4c] ss:$12 sps:$4 sm:$0xff]   ;;  %v4596_v9 = vld [vmem:[#allocation8 + $0x48] ss:$12 sps:$4 sm:$0xff]   ;;  %v4597_v10 = vld [vmem:[#allocation8 + $0x64] ss:$12 sps:$4 sm:$0xff]  }
  0x71   : > { %435 = vmatprep.subr.bf16.mxu0 %v4588_v4  ;;  %v4610_v11 = vld [vmem:[#allocation8 + $0x8] ss:$12 sps:$4 sm:$0xff]   ;;  %v4611_v12 = vld [vmem:[#allocation8 + $0x20] ss:$12 sps:$4 sm:$0xff]   ;;  %v4602_v15 = vld [vmem:[#allocation8 + $0x78] ss:$12 sps:$4 sm:$0xff]  }
  0x72   : > { %4314 = vmatpush3.bf16.msra.mxu1 %v4610_v11  ;;  %v4599_v13 = vld [vmem:[#allocation8 + $0x60] ss:$12 sps:$4 sm:$0xff]   ;;  %v4600_v14 = vld [vmem:[#allocation8 + $0x7c] ss:$12 sps:$4 sm:$0xff]   ;;  %v4612_v16 = vld [vmem:[#allocation8 + $0x38] ss:$12 sps:$4 sm:$0xff]  }
  0x73   : > { %4315 = vmatprep.subr.bf16.mxu1 %v4872_v1  ;;  %v4603_v17 = vld [vmem:[#allocation8 + $0x94] ss:$12 sps:$4 sm:$0xff]   ;;  %v4613_v18 = vld [vmem:[#allocation8 + $0x50] ss:$12 sps:$4 sm:$0xff]   ;;  %v4606_v20 = vld [vmem:[#allocation8 + $0xac] ss:$12 sps:$4 sm:$0xff]  }
  0x74   : > { %436 = vmatpush1.bf16.msra.mxu0 %v4590_v5  ;;  %v4605_v19 = vld [vmem:[#allocation8 + $0x90] ss:$12 sps:$4 sm:$0xff]   ;;  %v4614_v21 = vld [vmem:[#allocation8 + $0x68] ss:$12 sps:$4 sm:$0xff]   ;;  %v4615_v24 = vld [vmem:[#allocation8 + $0x80] ss:$12 sps:$4 sm:$0xff]  }
  0x75   : > { %437 = vmatprep.subr.bf16.mxu0 %v4591_v6  ;;  %v4608_v22 = vld [vmem:[#allocation8 + $0xa8] ss:$12 sps:$4 sm:$0xff]   ;;  %v4616_v25 = vld [vmem:[#allocation8 + $0x98] ss:$12 sps:$4 sm:$0xff]   ;;  %v4617_v26 = vld [vmem:[#allocation8 + $0xb0] ss:$12 sps:$4 sm:$0xff]  }
  0x76   : > { %4316 = vmatpush3.bf16.msra.mxu1 %v4611_v12  ;;  %s4874_s23 = smov 112   ;;  %s4875_s25 = smov 96   ;;  %v4881_v35 = vmov 1983009808   ;;  %v4882_v40 = vmov 1934713408  }
  0x77   : > { %4317 = vmatprep.subr.bf16.mxu1 %v4872_v1  ;;  %s4876_s27 = smov 80   ;;  %s4877_s14 = smov 64   ;;  %v564_v36 = vunpack.c.l.s4 %v4881_v35  ;;  %v628_v41 = vunpack.c.l.s4 %v4882_v40  ;;  %v567_v43 = vshrl.u32 %v566_v37, 7  ;;  %vm1113_vm1 = vcmask 130048  }
  0x78   : > { %438 = vmatpush1.bf16.msra.mxu0 %v4593_v7  ;;  %s4878_s21 = smov 48   ;;  %s4879_s29 = smov 32   ;;  %vm3874_vm2 = vcmask 261120   ;;  %vm3877_vm3 = vcmask 392192   ;;  %vm3880_vm4 = vcmask 523264   ;;  %vm3883_vm5 = vcmask 654336  }
  0x79   : > { %439 = vmatprep.subr.bf16.mxu0 %v4594_v8  ;;  %s4880_s22 = smov 16   ;;  %v565_v42 = vunpack.c.0.s8 %v564_v36  ;;  %v629_v46 = vunpack.c.0.s8 %v628_v41  ;;  %vm3886_vm6 = vcmask 785408   ;;  %vm3889_vm7 = vcmask 916480   ;;  %s4141_s28 = sshll.u32 %s5105_s8, 4 }
  0x7a   : > { %4318 = vmatpush3.bf16.msra.mxu1 %v4612_v16  ;;  %s258_s10 = scalar_lea.vmem [#allocation11], %s4141_s28  ;;  %s4262_s12 = sshll.u32 %s4854_s18, 8 }
  0x7b   : > { %4319 = vmatprep.subr.bf16.mxu1 %v4872_v1  ;;  %v5232_v47 = vsub.s32 %v565_v42, %v567_v43  ;;  %v5238_v54 = vsub.s32 %v629_v46, %v567_v43  ;;  %s4023_s13 = sshll.u32 %s258_s10, 4  ;;  %p5919_p12 = scmp.ne.s32.totalorder %s5915_s30, 0  ;;  %s5846_s13 = int_to_ptr.vmem [resolvable:$true] %s4023_s13 }
  0x7c   : > { %440 = vmatpush1.bf16.msra.mxu0 %v4596_v9  ;;  %s4776_s18 = scalar_lea.vmem %s5846_s13, 256 }
  0x7d   : > { %441 = vmatprep.subr.bf16.mxu0 %v4597_v10  ;;  %p4777_p8 = scmp.ne.s32.totalorder %s5846_s13, %s4776_s18 }
  0x7e   : > { %4320 = vmatpush3.bf16.msra.mxu1 %v4613_v18 }
  0x7f   : > { %4321 = vmatprep.subr.bf16.mxu1 %v4872_v1  ;;  %p4778_p1 = pnand %p4777_p8, %p5919_p12 }
  0x80   : > { %442 = vmatpush1.bf16.msra.mxu0 %v4599_v13 }
  0x81   : > { %443 = vmatprep.subr.bf16.mxu0 %v4600_v14  ;;  %p4779_p10 = pneg %p4778_p1 }
  0x82   : > { %4322 = vmatpush3.bf16.msra.mxu1 %v4614_v21 }
  0x83   : > { %4323 = vmatprep.subr.bf16.mxu1 %v4872_v1 }
  0x84   : > { %444 = vmatpush1.bf16.msra.mxu0 %v4602_v15 }
  0x85   : > { %445 = vmatprep.subr.bf16.mxu0 %v4603_v17 }
  0x86   : > { %4324 = vmatpush3.bf16.msra.mxu1 %v4615_v24 }
  0x87   : > { %4325 = vmatprep.subr.bf16.mxu1 %v4872_v1 }
  0x88   : > { %446 = vmatpush1.bf16.msra.mxu0 %v4605_v19 }
  0x89   : > { %447 = vmatprep.subr.bf16.mxu0 %v4606_v20 }
  0x8a   : > { %4326 = vmatpush3.bf16.msra.mxu1 %v4616_v25 }
  0x8b   : > { %4327 = vmatprep.subr.bf16.mxu1 %v4872_v1 }
  0x8c   : > { %448 = vmatpush1.bf16.msra.mxu0 %v4608_v22 }
  0x8d   : > { %4357 = vmatprep.subr.bf16.mxu0 %v4872_v1 }
  0x8e   : > { %4328 = vmatpush3.bf16.msra.mxu1 %v4617_v26 }
  0x8f   : > { %466 = vmatmul.mubr.bf16.vlgmr.msra.gmra.mrb[0].mxu0 %v4609_v23  ;;  %4333 = vmatprep.subr.bf16.mxu1 %v4872_v1 }
  0x90   : > { %4359 = vmatprep.mubr.msk.bf16.mxu0 %vm4873_vm0, %v4872_v1 }
  0x91   : > { %4330 = vmatmul.mubr.bf16.vlgmr.msra.gmra.mrb[0].mxu1 %v4609_v23 }
  0x92   : > { %4335 = vmatprep.mubr.msk.bf16.mxu1 %vm4873_vm0, %v4872_v1 }
 0x162   : > { %v5136_v27 = vpop.f32.mrb[0].mxu0 }
 0x163   : > { %519 = vrot.lane.b32.xlu0 %v5136_v27, %s4874_s23  ;;  %v5140_v28 = vpop.f32.mrb[1].mxu0 }
 0x164   : > { %1130 = vrot.lane.b32.xlu1 %v5140_v28, %s4875_s25  ;;  %v5144_v29 = vpop.f32.mrb[2].mxu0  ;;  %v5200_v31 = vpop.f32.mrb[0].mxu1 }
 0x165   : > { %v5146_v30 = vpop.f32.mrb[3].mxu0  ;;  %v4331_v32 = vpop.f32.mrb[1].mxu1 }
 0x166   : > { %v5204_v33 = vpop.f32.mrb[2].mxu1 }
 0x167   : > { %1124 = vrot.lane.b32.xlu0 %v5140_v28, %s4874_s23  ;;  %v4332_v34 = vpop.f32.mrb[3].mxu1 }
 0x168   : > { %521 = vrot.lane.b32.xlu1 %v5144_v29, %s4874_s23 }
 0x16b   : > { %1136 = vrot.lane.b32.xlu0 %v5140_v28, %s4876_s27 }
 0x16c   : > { %1132 = vrot.lane.b32.xlu1 %v5146_v30, %s4875_s25 }
 0x16f   : > { %1126 = vrot.lane.b32.xlu0 %v5146_v30, %s4874_s23 }
 0x170   : > { %1138 = vrot.lane.b32.xlu1 %v5146_v30, %s4876_s27 }
 0x173   : > { %525 = vrot.lane.b32.xlu0 %v5136_v27, %s4875_s25 }
 0x174   : > { %527 = vrot.lane.b32.xlu1 %v5144_v29, %s4875_s25 }
 0x177   : > { %531 = vrot.lane.b32.xlu0 %v5136_v27, %s4876_s27 }
 0x178   : > { %533 = vrot.lane.b32.xlu1 %v5144_v29, %s4876_s27 }
 0x17b   : > { %1142 = vrot.lane.b32.xlu0 %v5140_v28, %s4877_s14 }
 0x17c   : > { %539 = vrot.lane.b32.xlu1 %v5144_v29, %s4877_s14 }
 0x17f   : > { %1148 = vrot.lane.b32.xlu0 %v5140_v28, %s4878_s21 }
 0x180   : > { %545 = vrot.lane.b32.xlu1 %v5144_v29, %s4878_s21 }
 0x183   : > { %1154 = vrot.lane.b32.xlu0 %v5140_v28, %s4879_s29 }
 0x184   : > { %1144 = vrot.lane.b32.xlu1 %v5146_v30, %s4877_s14 }
 0x187   : > { %1160 = vrot.lane.b32.xlu0 %v5140_v28, %s4880_s22 }
 0x188   : > { %1150 = vrot.lane.b32.xlu1 %v5146_v30, %s4878_s21 }
 0x18b   : > { %537 = vrot.lane.b32.xlu0 %v5136_v27, %s4877_s14 }
 0x18c   : > { %1156 = vrot.lane.b32.xlu1 %v5146_v30, %s4879_s29 }
 0x18f   : > { %543 = vrot.lane.b32.xlu0 %v5136_v27, %s4878_s21 }
 0x190   : > { %1162 = vrot.lane.b32.xlu1 %v5146_v30, %s4880_s22 }
 0x193   : > { %549 = vrot.lane.b32.xlu0 %v5136_v27, %s4879_s29 }
 0x194   : > { %551 = vrot.lane.b32.xlu1 %v5144_v29, %s4879_s29 }
 0x197   : > { %555 = vrot.lane.b32.xlu0 %v5136_v27, %s4880_s22 }
 0x198   : > { %557 = vrot.lane.b32.xlu1 %v5144_v29, %s4880_s22 }
 0x19b   : > { %1728 = vrot.lane.b32.xlu0 %v5200_v31, %s4874_s23 }
 0x19c   : > { %1730 = vrot.lane.b32.xlu1 %v5204_v33, %s4874_s23 }
 0x19f   : > { %1734 = vrot.lane.b32.xlu0 %v5200_v31, %s4875_s25 }
 0x1a0   : > { %1736 = vrot.lane.b32.xlu1 %v5204_v33, %s4875_s25 }
 0x1a3   : > { %1740 = vrot.lane.b32.xlu0 %v5200_v31, %s4876_s27 }
 0x1a4   : > { %1742 = vrot.lane.b32.xlu1 %v5204_v33, %s4876_s27 }
 0x1a7   : > { %1748 = vrot.lane.b32.xlu0 %v5204_v33, %s4877_s14 }
 0x1a8   : > { %1746 = vrot.lane.b32.xlu1 %v5200_v31, %s4877_s14 }
 0x1ab   : > { %1758 = vrot.lane.b32.xlu0 %v5200_v31, %s4879_s29 }
 0x1ac   : > { %1752 = vrot.lane.b32.xlu1 %v5200_v31, %s4878_s21 }
 0x1af   : > { %1764 = vrot.lane.b32.xlu0 %v5200_v31, %s4880_s22 }
 0x1b0   : > { %1754 = vrot.lane.b32.xlu1 %v5204_v33, %s4878_s21 }
 0x1b4   : > { %1760 = vrot.lane.b32.xlu1 %v5204_v33, %s4879_s29 }
 0x1d5   : > { %v5222_v38 = vpop.permute.xlu0 %519 }
 0x1d6   : > { %v1131_v39 = vpop.permute.xlu1 %1130 }
 0x1d7   : > { %v1166_v48 = vcombine.low %v5140_v28, %v1131_v39  ;;  %v1167_v49 = vcombine.high %v5140_v28, %v1131_v39 }
 0x1d9   : > { %v1125_v44 = vpop.permute.xlu0 %1124  ;;  %v1174_v55 = vrot.slane %v1166_v48, %v5232_v47  ;;  %v1181_v56 = vrot.slane %v1167_v49, %v5232_v47 }
 0x1da   : > { %v5230_v45 = vpop.permute.xlu1 %521 }
 0x1dd   : > { %v1137_v50 = vpop.permute.xlu0 %1136 }
 0x1de   : > { %v1182_v51 = vcombine.low %v1125_v44, %v1137_v50  ;;  %v1183_v52 = vcombine.high %v1125_v44, %v1137_v50  ;;  %v1133_v53 = vpop.permute.xlu1 %1132 }
 0x1df   : > { %v1302_v59 = vcombine.low %v5146_v30, %v1133_v53  ;;  %v1303_v60 = vcombine.high %v5146_v30, %v1133_v53 }
 0x1e0   : > { %v1190_v57 = vrot.slane %v1182_v51, %v5232_v47  ;;  %v1197_v58 = vrot.slane %v1183_v52, %v5232_v47 }
 0x1e1   : > { %v1127_v61 = vpop.permute.xlu0 %1126  ;;  %v1310_v10 = vrot.slane %v1302_v59, %v5232_v47  ;;  %v1317_v11 = vrot.slane %v1303_v60, %v5232_v47 }
 0x1e2   : > { %v1230_v62 = vcombine.low %v1174_v55, %v1190_v57  ;;  %v1231_v63 = vcombine.high %v1174_v55, %v1190_v57  ;;  %v1246_v0 = vcombine.low %v1181_v56, %v1197_v58  ;;  %v1247_v2 = vcombine.high %v1181_v56, %v1197_v58  ;;  %v1139_v3 = vpop.permute.xlu1 %1138 }
 0x1e3   : > { %v1318_v4 = vcombine.low %v1127_v61, %v1139_v3  ;;  %v1319_v5 = vcombine.high %v1127_v61, %v1139_v3 }
 0x1e4   : > { %v1238_v6 = vrot.slane %v1230_v62, %v5238_v54  ;;  %v1245_v7 = vrot.slane %v1231_v63, %v5238_v54  ;;  %v1254_v8 = vrot.slane %v1246_v0, %v5238_v54  ;;  %v1261_v9 = vrot.slane %v1247_v2, %v5238_v54 }
 0x1e5   : > { %v1326_v12 = vrot.slane %v1318_v4, %v5232_v47  ;;  %v1333_v13 = vrot.slane %v1319_v5, %v5232_v47  ;;  %v526_v14 = vpop.permute.xlu0 %525 }
 0x1e6   : > { %v4183_v15 = vcombine.low %v1238_v6, %v1245_v7  ;;  %v4185_v16 = vcombine.high %v1238_v6, %v1245_v7  ;;  %v4187_v17 = vcombine.low %v1254_v8, %v1261_v9  ;;  %v4189_v18 = vcombine.high %v1254_v8, %v1261_v9  ;;  %v5254_v19 = vpop.permute.xlu1 %527 }
 0x1e7   : > { %v1366_v20 = vcombine.low %v1310_v10, %v1326_v12  ;;  %v1367_v21 = vcombine.high %v1310_v10, %v1326_v12  ;;  %v1382_v22 = vcombine.low %v1317_v11, %v1333_v13  ;;  %v1383_v23 = vcombine.high %v1317_v11, %v1333_v13 }
 0x1e8   : > { %v1446_v24 = vrot.slane %v4183_v15, %v5232_v47  ;;  %v1462_v25 = vrot.slane %v4185_v16, %v5232_v47  ;;  %v1478_v26 = vrot.slane %v4187_v17, %v5232_v47  ;;  %v1494_v28 = vrot.slane %v4189_v18, %v5232_v47 }
 0x1e9   : > { %v1374_v30 = vrot.slane %v1366_v20, %v5238_v54  ;;  %v1381_v32 = vrot.slane %v1367_v21, %v5238_v54  ;;  %v1390_v34 = vrot.slane %v1382_v22, %v5238_v54  ;;  %v1397_v35 = vrot.slane %v1383_v23, %v5238_v54  ;;  %v532_v36 = vpop.permute.xlu0 %531 }
 0x1ea   : > { %v1502_v37 = vcombine.low %v1446_v24, %v1462_v25  ;;  %v1503_v39 = vcombine.high %v1446_v24, %v1462_v25  ;;  %v1534_v40 = vcombine.low %v1478_v26, %v1494_v28  ;;  %v1535_v41 = vcombine.high %v1478_v26, %v1494_v28  ;;  %v534_v42 = vpop.permute.xlu1 %533 }
 0x1eb   : > { %v4191_v43 = vcombine.low %v1374_v30, %v1381_v32  ;;  %v4193_v44 = vcombine.high %v1374_v30, %v1381_v32  ;;  %v4195_v46 = vcombine.low %v1390_v34, %v1397_v35  ;;  %v4197_v48 = vcombine.high %v1390_v34, %v1397_v35 }
 0x1ec   : > { %v1510_v49 = vrot.slane %v1502_v37, %v5238_v54  ;;  %v1517_v50 = vrot.slane %v1503_v39, %v5238_v54  ;;  %v1542_v51 = vrot.slane %v1534_v40, %v5238_v54  ;;  %v1549_v52 = vrot.slane %v1535_v41, %v5238_v54 }
 0x1ed   : > { %v1582_v53 = vrot.slane %v4191_v43, %v5232_v47  ;;  %v1598_v55 = vrot.slane %v4193_v44, %v5232_v47  ;;  %v1614_v56 = vrot.slane %v4195_v46, %v5232_v47  ;;  %v1630_v57 = vrot.slane %v4197_v48, %v5232_v47  ;;  %v5272_v58 = vpop.permute.xlu0 %1142 }
 0x1ee   : > { %v1566_v59 = vcombine.low %v1510_v49, %v1542_v51  ;;  %v1567_v60 = vcombine.high %v1510_v49, %v1542_v51  ;;  %v5274_v61 = vpop.permute.xlu1 %539  ;;  %v1568_v3 = vcombine.low %v1517_v50, %v1549_v52  ;;  %v1569_v4 = vcombine.high %v1517_v50, %v1549_v52 }
 0x1ef   : > { %v1638_v62 = vcombine.low %v1582_v53, %v1598_v55  ;;  %v1639_v63 = vcombine.high %v1582_v53, %v1598_v55  ;;  %v1670_v0 = vcombine.low %v1614_v56, %v1630_v57  ;;  %v1671_v2 = vcombine.high %v1614_v56, %v1630_v57 }
 0x1f0   : > { %v561_v5 = vcombine.low %v5136_v27, %v526_v14  ;;  %v562_v6 = vcombine.high %v5136_v27, %v526_v14  ;;  %v697_v15 = vcombine.low %v5144_v29, %v5254_v19  ;;  %v698_v27 = vcombine.high %v5144_v29, %v5254_v19 }
 0x1f1   : > { %v1646_v7 = vrot.slane %v1638_v62, %v5238_v54  ;;  %v1653_v8 = vrot.slane %v1639_v63, %v5238_v54  ;;  %v1678_v9 = vrot.slane %v1670_v0, %v5238_v54  ;;  %v1685_v10 = vrot.slane %v1671_v2, %v5238_v54  ;;  %v5282_v11 = vpop.permute.xlu0 %1148 }
 0x1f2   : > { %v569_v12 = vrot.slane %v561_v5, %v5232_v47  ;;  %v576_v13 = vrot.slane %v562_v6, %v5232_v47  ;;  %v5290_v14 = vpop.permute.xlu1 %545  ;;  %v577_v21 = vcombine.low %v5222_v38, %v532_v36  ;;  %v578_v22 = vcombine.high %v5222_v38, %v532_v36 }
 0x1f3   : > { %v1702_v16 = vcombine.low %v1646_v7, %v1678_v9  ;;  %v1703_v17 = vcombine.high %v1646_v7, %v1678_v9  ;;  %v1704_v18 = vcombine.low %v1653_v8, %v1685_v10  ;;  %v1705_v20 = vcombine.high %v1653_v8, %v1685_v10 }
 0x1f4   : > { %v713_v23 = vcombine.low %v5230_v45, %v534_v42  ;;  %v714_v24 = vcombine.high %v5230_v45, %v534_v42  ;;  %v585_v29 = vrot.slane %v577_v21, %v5232_v47  ;;  %v592_v19 = vrot.slane %v578_v22, %v5232_v47 }
 0x1f5   : > { %v1710_v25 = vpack.c.bf16 %v1702_v16, %v1566_v59  ;;  %v1711_v26 = vpack.c.bf16 %v1703_v17, %v1567_v60  ;;  %v1712_v28 = vpack.c.bf16 %v1704_v18, %v1568_v3  ;;  %v1713_v30 = vpack.c.bf16 %v1705_v20, %v1569_v4  ;;  %v5296_v32 = vpop.permute.xlu0 %1154 }
 0x1f6   : > { %v721_v34 = vrot.slane %v713_v23, %v5232_v47  ;;  %v728_v35 = vrot.slane %v714_v24, %v5232_v47  ;;  %v5302_v37 = vpop.permute.xlu1 %1144  ;;  %v705_v38 = vrot.slane %v697_v15, %v5232_v47  ;;  %v712_v45 = vrot.slane %v698_v27, %v5232_v47 }
 0x1f7   : > { %1718 = vst.msk [vmem:[#allocation3] sm:$0xff] %vm1113_vm1, %v1710_v25  ;;  %1719 = vst.msk [vmem:[#allocation3 + $0x8] sm:$0xff] %vm1113_vm1, %v1711_v26  ;;  %v1198_v36 = vcombine.low %v5272_v58, %v5296_v32  ;;  %v1199_v39 = vcombine.high %v5272_v58, %v5296_v32  ;;  %v625_v40 = vcombine.low %v569_v12, %v585_v29 }
 0x1f8   : > { %1720 = vst.msk [vmem:[#allocation3 + $0x10] sm:$0xff] %vm1113_vm1, %v1712_v28  ;;  %1721 = vst.msk [vmem:[#allocation3 + $0x18] sm:$0xff] %vm1113_vm1, %v1713_v30  ;;  %v626_v41 = vcombine.high %v569_v12, %v585_v29  ;;  %v641_v42 = vcombine.low %v576_v13, %v592_v19  ;;  %v642_v43 = vcombine.high %v576_v13, %v592_v19 }
 0x1f9   : > { %v761_v44 = vcombine.low %v705_v38, %v721_v34  ;;  %v762_v46 = vcombine.high %v705_v38, %v721_v34  ;;  %v777_v48 = vcombine.low %v712_v45, %v728_v35  ;;  %v778_v49 = vcombine.high %v712_v45, %v728_v35  ;;  %v1161_v25 = vpop.permute.xlu0 %1160 }
 0x1fa   : > { %v633_v50 = vrot.slane %v625_v40, %v5238_v54  ;;  %v640_v51 = vrot.slane %v626_v41, %v5238_v54  ;;  %v649_v52 = vrot.slane %v641_v42, %v5238_v54  ;;  %v656_v53 = vrot.slane %v642_v43, %v5238_v54  ;;  %v5318_v55 = vpop.permute.xlu1 %1150 }
 0x1fb   : > { %v769_v56 = vrot.slane %v761_v44, %v5238_v54  ;;  %v776_v57 = vrot.slane %v762_v46, %v5238_v54  ;;  %v785_v58 = vrot.slane %v777_v48, %v5238_v54  ;;  %v792_v59 = vrot.slane %v778_v49, %v5238_v54 }
 0x1fc   : > { %v4167_v60 = vcombine.low %v633_v50, %v640_v51  ;;  %v4169_v62 = vcombine.high %v633_v50, %v640_v51  ;;  %v4171_v63 = vcombine.low %v649_v52, %v656_v53  ;;  %v4173_v0 = vcombine.high %v649_v52, %v656_v53 }
 0x1fd   : > { %v4175_v2 = vcombine.low %v769_v56, %v776_v57  ;;  %v4177_v3 = vcombine.high %v769_v56, %v776_v57  ;;  %v4179_v4 = vcombine.low %v785_v58, %v792_v59  ;;  %v4181_v5 = vcombine.high %v785_v58, %v792_v59 }
 0x1fe   : > { %v841_v6 = vrot.slane %v4167_v60, %v5232_v47  ;;  %v857_v7 = vrot.slane %v4169_v62, %v5232_v47  ;;  %v873_v8 = vrot.slane %v4171_v63, %v5232_v47  ;;  %v889_v9 = vrot.slane %v4173_v0, %v5232_v47  ;;  %v1157_v20 = vpop.permute.xlu1 %1156  ;;  %v2343_v52 = vld [vmem:[#allocation3] sm:$0xff]  ;;  %v5344_v60 = vpop.permute.xlu0 %537 }
 0x1ff   : > { %v977_v10 = vrot.slane %v4175_v2, %v5232_v47  ;;  %v993_v12 = vrot.slane %v4177_v3, %v5232_v47  ;;  %v1009_v13 = vrot.slane %v4179_v4, %v5232_v47  ;;  %v1025_v15 = vrot.slane %v4181_v5, %v5232_v47 }
 0x200   : > { %v897_v27 = vcombine.low %v841_v6, %v857_v7  ;;  %v898_v16 = vcombine.high %v841_v6, %v857_v7  ;;  %v929_v17 = vcombine.low %v873_v8, %v889_v9  ;;  %v930_v18 = vcombine.high %v873_v8, %v889_v9 }
 0x201   : > { %v1033_v21 = vcombine.low %v977_v10, %v993_v12  ;;  %v1034_v22 = vcombine.high %v977_v10, %v993_v12  ;;  %v1065_v23 = vcombine.low %v1009_v13, %v1025_v15  ;;  %v1066_v24 = vcombine.high %v1009_v13, %v1025_v15 }
 0x202   : > { %v905_v26 = vrot.slane %v897_v27, %v5238_v54  ;;  %v912_v28 = vrot.slane %v898_v16, %v5238_v54  ;;  %v937_v30 = vrot.slane %v929_v17, %v5238_v54  ;;  %v944_v32 = vrot.slane %v930_v18, %v5238_v54  ;;  %v1163_v53 = vpop.permute.xlu1 %1162  ;;  %v5366_v15 = vpop.permute.xlu0 %543 }
 0x203   : > { %v1041_v29 = vrot.slane %v1033_v21, %v5238_v54  ;;  %v1048_v19 = vrot.slane %v1034_v22, %v5238_v54  ;;  %v1073_v34 = vrot.slane %v1065_v23, %v5238_v54  ;;  %v1080_v35 = vrot.slane %v1066_v24, %v5238_v54 }
 0x204   : > { %v961_v38 = vcombine.low %v905_v26, %v937_v30  ;;  %v962_v45 = vcombine.high %v905_v26, %v937_v30  ;;  %v963_v40 = vcombine.low %v912_v28, %v944_v32  ;;  %v964_v41 = vcombine.high %v912_v28, %v944_v32 }
 0x205   : > { %v1097_v42 = vcombine.low %v1041_v29, %v1073_v34  ;;  %v1098_v43 = vcombine.high %v1041_v29, %v1073_v34  ;;  %v1099_v44 = vcombine.low %v1048_v19, %v1080_v35  ;;  %v1100_v46 = vcombine.high %v1048_v19, %v1080_v35 }
 0x206   : > { %v1206_v48 = vrot.slane %v1198_v36, %v5232_v47  ;;  %v1213_v49 = vrot.slane %v1199_v39, %v5232_v47  ;;  %v1214_v50 = vcombine.low %v5282_v11, %v1161_v25  ;;  %v1215_v51 = vcombine.high %v5282_v11, %v1161_v25 }
 0x207   : > { %v1105_v56 = vpack.c.bf16 %v1097_v42, %v961_v38  ;;  %v1106_v57 = vpack.c.bf16 %v1098_v43, %v962_v45  ;;  %v1107_v58 = vpack.c.bf16 %v1099_v44, %v963_v40  ;;  %v1108_v59 = vpack.c.bf16 %v1100_v46, %v964_v41 }
 0x208   : > { %v1222_v62 = vrot.slane %v1214_v50, %v5232_v47  ;;  %v1229_v63 = vrot.slane %v1215_v51, %v5232_v47  ;;  %v1334_v36 = vcombine.low %v5302_v37, %v1157_v20  ;;  %v1335_v39 = vcombine.high %v5302_v37, %v1157_v20  ;;  %v550_v51 = vpop.permute.xlu0 %549 }
 0x209   : > { %1114 = vst.msk [vmem:[#allocation2] sm:$0xff] %vm1113_vm1, %v1105_v56  ;;  %1115 = vst.msk [vmem:[#allocation2 + $0x8] sm:$0xff] %vm1113_vm1, %v1106_v57  ;;  %v2356_v11 = vsel %vm1113_vm1, %v2343_v52, 0  ;;  %v1350_v0 = vcombine.low %v5318_v55, %v1163_v53  ;;  %v1351_v2 = vcombine.high %v5318_v55, %v1163_v53  ;;  %v552_v52 = vpop.permute.xlu1 %551 }
 0x20a   : > { %1116 = vst.msk [vmem:[#allocation2 + $0x10] sm:$0xff] %vm1113_vm1, %v1107_v58  ;;  %1117 = vst.msk [vmem:[#allocation2 + $0x18] sm:$0xff] %vm1113_vm1, %v1108_v59  ;;  %v1262_v3 = vcombine.low %v1206_v48, %v1222_v62  ;;  %v1263_v4 = vcombine.high %v1206_v48, %v1222_v62  ;;  %v1278_v5 = vcombine.low %v1213_v49, %v1229_v63  ;;  %4334 = vmatpush3.bf16.xpose.msra.mxu1 %v2356_v11 }
 0x20b   : > { %v1279_v6 = vcombine.high %v1213_v49, %v1229_v63  ;;  %v1342_v37 = vrot.slane %v1334_v36, %v5232_v47  ;;  %v1349_v7 = vrot.slane %v1335_v39, %v5232_v47  ;;  %v1358_v8 = vrot.slane %v1350_v0, %v5232_v47  ;;  %4339 = vmatprep.subr.bf16.mxu1 %v4872_v1 }
 0x20c   : > { %v1365_v9 = vrot.slane %v1351_v2, %v5232_v47  ;;  %v1270_v10 = vrot.slane %v1262_v3, %v5238_v54  ;;  %v1277_v12 = vrot.slane %v1263_v4, %v5238_v54  ;;  %v1286_v55 = vrot.slane %v1278_v5, %v5238_v54  ;;  %v2344_v5 = vld [vmem:[#allocation3 + $0x8] sm:$0xff] }
 0x20d   : > { %v1293_v13 = vrot.slane %v1279_v6, %v5238_v54  ;;  %v1398_v27 = vcombine.low %v1342_v37, %v1358_v8  ;;  %v1399_v16 = vcombine.high %v1342_v37, %v1358_v8  ;;  %v593_v11 = vcombine.low %v5344_v60, %v550_v51 }
 0x20e   : > { %v1414_v17 = vcombine.low %v1349_v7, %v1365_v9  ;;  %v1415_v18 = vcombine.high %v1349_v7, %v1365_v9  ;;  %v4184_v20 = vcombine.low %v1270_v10, %v1277_v12  ;;  %v4186_v21 = vcombine.high %v1270_v10, %v1277_v12 }
 0x20f   : > { %v4188_v22 = vcombine.low %v1286_v55, %v1293_v13  ;;  %v4190_v23 = vcombine.high %v1286_v55, %v1293_v13  ;;  %v1406_v24 = vrot.slane %v1398_v27, %v5238_v54  ;;  %v1413_v25 = vrot.slane %v1399_v16, %v5238_v54  ;;  %v556_v13 = vpop.permute.xlu0 %555  ;;  %v558_v27 = vpop.permute.xlu1 %557 }
 0x210   : > { %v1422_v26 = vrot.slane %v1414_v17, %v5238_v54  ;;  %v1429_v28 = vrot.slane %v1415_v18, %v5238_v54  ;;  %v1453_v30 = vrot.slane %v4184_v20, %v5232_v47  ;;  %v1469_v32 = vrot.slane %v4186_v21, %v5232_v47  ;;  %v2335_v34 = vld [vmem:[#allocation2] sm:$0xff] }
 0x211   : > { %v1485_v29 = vrot.slane %v4188_v22, %v5232_v47  ;;  %v1501_v19 = vrot.slane %v4190_v23, %v5232_v47  ;;  %v4192_v35 = vcombine.low %v1406_v24, %v1413_v25  ;;  %v4194_v38 = vcombine.high %v1406_v24, %v1413_v25  ;;  %4336 = vmatmul.mubr.msk.bf16.vlgmr.msra.gmra.mrb[4].mxu1 %vm1113_vm1, %v2335_v34 }
 0x212   : > { %v4196_v45 = vcombine.low %v1422_v26, %v1429_v28  ;;  %v4198_v40 = vcombine.high %v1422_v26, %v1429_v28  ;;  %v1518_v41 = vcombine.low %v1453_v30, %v1469_v32  ;;  %v1519_v42 = vcombine.high %v1453_v30, %v1469_v32  ;;  %4341 = vmatprep.mubr.msk.bf16.mxu1 %vm4873_vm0, %v4872_v1  ;;  %v2345_v28 = vld [vmem:[#allocation3 + $0x10] sm:$0xff]  ;;  %v2346_v30 = vld [vmem:[#allocation3 + $0x18] sm:$0xff] }
 0x213   : > { %v1550_v43 = vcombine.low %v1485_v29, %v1501_v19  ;;  %v1551_v44 = vcombine.high %v1485_v29, %v1501_v19  ;;  %v1589_v46 = vrot.slane %v4192_v35, %v5232_v47  ;;  %v1605_v48 = vrot.slane %v4194_v38, %v5232_v47 }
 0x214   : > { %v1621_v49 = vrot.slane %v4196_v45, %v5232_v47  ;;  %v1637_v50 = vrot.slane %v4198_v40, %v5232_v47  ;;  %v1526_v53 = vrot.slane %v1518_v41, %v5238_v54  ;;  %v1533_v56 = vrot.slane %v1519_v42, %v5238_v54 }
 0x215   : > { %v1558_v57 = vrot.slane %v1550_v43, %v5238_v54  ;;  %v1565_v58 = vrot.slane %v1551_v44, %v5238_v54  ;;  %v1654_v59 = vcombine.low %v1589_v46, %v1605_v48  ;;  %v1655_v62 = vcombine.high %v1589_v46, %v1605_v48 }
 0x216   : > { %v1686_v63 = vcombine.low %v1621_v49, %v1637_v50  ;;  %v1687_v36 = vcombine.high %v1621_v49, %v1637_v50  ;;  %v594_v8 = vcombine.high %v5344_v60, %v550_v51  ;;  %v729_v16 = vcombine.low %v5274_v61, %v552_v52  ;;  %v2336_v50 = vld [vmem:[#allocation2 + $0x8] sm:$0xff] }
 0x217   : > { %v1570_v39 = vcombine.low %v1526_v53, %v1558_v57  ;;  %v1662_v0 = vrot.slane %v1654_v59, %v5238_v54  ;;  %v1669_v2 = vrot.slane %v1655_v62, %v5238_v54  ;;  %v1571_v6 = vcombine.high %v1526_v53, %v1558_v57 }
 0x218   : > { %v1694_v3 = vrot.slane %v1686_v63, %v5238_v54  ;;  %v1701_v4 = vrot.slane %v1687_v36, %v5238_v54  ;;  %v1572_v37 = vcombine.low %v1533_v56, %v1565_v58  ;;  %v1573_v7 = vcombine.high %v1533_v56, %v1565_v58 }
 0x219   : > { %v730_v17 = vcombine.high %v5274_v61, %v552_v52  ;;  %v2403_v18 = vsel %vm1113_vm1, %v2344_v5, 0  ;;  %v609_v24 = vcombine.low %v5366_v15, %v556_v13  ;;  %v610_v60 = vcombine.high %v5366_v15, %v556_v13 }
 0x21a   : > { %v1706_v9 = vcombine.low %v1662_v0, %v1694_v3  ;;  %v1707_v10 = vcombine.high %v1662_v0, %v1694_v3  ;;  %v1708_v12 = vcombine.low %v1669_v2, %v1701_v4  ;;  %v1709_v55 = vcombine.high %v1669_v2, %v1701_v4  ;;  %4340 = vmatpush3.bf16.xpose.msra.mxu1 %v2403_v18 }
 0x21b   : > { %v745_v25 = vcombine.low %v5290_v14, %v558_v27  ;;  %v746_v26 = vcombine.high %v5290_v14, %v558_v27  ;;  %4345 = vmatprep.subr.bf16.mxu1 %v4872_v1  ;;  %v601_v61 = vrot.slane %v593_v11, %v5232_v47  ;;  %v608_v15 = vrot.slane %v594_v8, %v5232_v47 }
 0x21c   : > { %v1714_v20 = vpack.c.bf16 %v1706_v9, %v1570_v39  ;;  %v1715_v21 = vpack.c.bf16 %v1707_v10, %v1571_v6  ;;  %v1716_v22 = vpack.c.bf16 %v1708_v12, %v1572_v37  ;;  %v1717_v23 = vpack.c.bf16 %v1709_v55, %v1573_v7 }
 0x21d   : > { %v617_v32 = vrot.slane %v609_v24, %v5232_v47  ;;  %v624_v14 = vrot.slane %v610_v60, %v5232_v47  ;;  %v753_v29 = vrot.slane %v745_v25, %v5232_v47  ;;  %v760_v19 = vrot.slane %v746_v26, %v5232_v47 }
 0x21e   : > { %1722 = vst.msk [vmem:[#allocation3 + $0x20] sm:$0xff] %vm1113_vm1, %v1714_v20  ;;  %1723 = vst.msk [vmem:[#allocation3 + $0x28] sm:$0xff] %vm1113_vm1, %v1715_v21  ;;  %v737_v34 = vrot.slane %v729_v16, %v5232_v47  ;;  %v744_v35 = vrot.slane %v730_v17, %v5232_v47  ;;  %v2450_v38 = vsel %vm1113_vm1, %v2345_v28, 0  ;;  %v2497_v45 = vsel %vm1113_vm1, %v2346_v30, 0 }
 0x21f   : > { %1724 = vst.msk [vmem:[#allocation3 + $0x30] sm:$0xff] %vm1113_vm1, %v1716_v22  ;;  %1725 = vst.msk [vmem:[#allocation3 + $0x38] sm:$0xff] %vm1113_vm1, %v1717_v23  ;;  %v657_v40 = vcombine.low %v601_v61, %v617_v32  ;;  %v658_v41 = vcombine.high %v601_v61, %v617_v32  ;;  %v673_v42 = vcombine.low %v608_v15, %v624_v14  ;;  %v2337_v22 = vld [vmem:[#allocation2 + $0x10] sm:$0xff] }
 0x220   : > { %v674_v43 = vcombine.high %v608_v15, %v624_v14  ;;  %v793_v44 = vcombine.low %v737_v34, %v753_v29  ;;  %v794_v46 = vcombine.high %v737_v34, %v753_v29  ;;  %v809_v48 = vcombine.low %v744_v35, %v760_v19 }
 0x221   : > { %v810_v49 = vcombine.high %v744_v35, %v760_v19  ;;  %v665_v51 = vrot.slane %v657_v40, %v5238_v54  ;;  %v672_v52 = vrot.slane %v658_v41, %v5238_v54  ;;  %v681_v53 = vrot.slane %v673_v42, %v5238_v54  ;;  %4342 = vmatmul.mubr.msk.bf16.vlgmr.msra.gmra.mrb[8].mxu1 %vm1113_vm1, %v2336_v50  ;;  %v1729_v50 = vpop.permute.xlu0 %1728 }
 0x222   : > { %v688_v56 = vrot.slane %v674_v43, %v5238_v54  ;;  %v801_v57 = vrot.slane %v793_v44, %v5238_v54  ;;  %v808_v58 = vrot.slane %v794_v46, %v5238_v54  ;;  %v817_v59 = vrot.slane %v809_v48, %v5238_v54  ;;  %4346 = vmatpush3.bf16.xpose.msra.mxu1 %v2450_v38 }
 0x223   : > { %v824_v62 = vrot.slane %v810_v49, %v5238_v54  ;;  %v4168_v63 = vcombine.low %v665_v51, %v672_v52  ;;  %v4170_v36 = vcombine.high %v665_v51, %v672_v52  ;;  %4347 = vmatprep.mubr.msk.bf16.mxu1 %vm4873_vm0, %v4872_v1  ;;  %4351 = vmatprep.subr.bf16.mxu1 %v4872_v1  ;;  %v2338_v49 = vld [vmem:[#allocation2 + $0x18] sm:$0xff] }
 0x224   : > { %v4172_v39 = vcombine.low %v681_v53, %v688_v56  ;;  %v4174_v11 = vcombine.high %v681_v53, %v688_v56  ;;  %v4176_v0 = vcombine.low %v801_v57, %v808_v58  ;;  %v4178_v2 = vcombine.high %v801_v57, %v808_v58  ;;  %v1731_v53 = vpop.permute.xlu1 %1730 }
 0x225   : > { %v4180_v3 = vcombine.low %v817_v59, %v824_v62  ;;  %v4182_v4 = vcombine.high %v817_v59, %v824_v62  ;;  %v848_v5 = vrot.slane %v4168_v63, %v5232_v47  ;;  %v864_v6 = vrot.slane %v4170_v36, %v5232_v47  ;;  %v2347_v15 = vld [vmem:[#allocation3 + $0x20] sm:$0xff]  ;;  %v2348_v41 = vld [vmem:[#allocation3 + $0x28] sm:$0xff]  ;;  %v1735_v59 = vpop.permute.xlu0 %1734 }
 0x226   : > { %v880_v37 = vrot.slane %v4172_v39, %v5232_v47  ;;  %v896_v7 = vrot.slane %v4174_v11, %v5232_v47  ;;  %v984_v8 = vrot.slane %v4176_v0, %v5232_v47  ;;  %v1000_v9 = vrot.slane %v4178_v2, %v5232_v47  ;;  %v2349_v51 = vld [vmem:[#allocation3 + $0x30] sm:$0xff]  ;;  %v2350_v52 = vld [vmem:[#allocation3 + $0x38] sm:$0xff] }
 0x227   : > { %v1016_v10 = vrot.slane %v4180_v3, %v5232_v47  ;;  %v1032_v12 = vrot.slane %v4182_v4, %v5232_v47  ;;  %v913_v55 = vcombine.low %v848_v5, %v864_v6  ;;  %v914_v13 = vcombine.high %v848_v5, %v864_v6 }
 0x228   : > { %v945_v27 = vcombine.low %v880_v37, %v896_v7  ;;  %v946_v16 = vcombine.high %v880_v37, %v896_v7  ;;  %v1049_v17 = vcombine.low %v984_v8, %v1000_v9  ;;  %v1050_v18 = vcombine.high %v984_v8, %v1000_v9  ;;  %v1737_v36 = vpop.permute.xlu1 %1736 }
 0x229   : > { %v1081_v20 = vcombine.low %v1016_v10, %v1032_v12  ;;  %v1082_v21 = vcombine.high %v1016_v10, %v1032_v12  ;;  %v921_v23 = vrot.slane %v913_v55, %v5238_v54  ;;  %v928_v24 = vrot.slane %v914_v13, %v5238_v54  ;;  %4348 = vmatmul.mubr.msk.bf16.vlgmr.msra.gmra.mrb[12].mxu1 %vm1113_vm1, %v2337_v22  ;;  %v1741_v2 = vpop.permute.xlu0 %1740 }
 0x22a   : > { %v953_v60 = vrot.slane %v945_v27, %v5238_v54  ;;  %v960_v25 = vrot.slane %v946_v16, %v5238_v54  ;;  %v1057_v26 = vrot.slane %v1049_v17, %v5238_v54  ;;  %v1064_v28 = vrot.slane %v1050_v18, %v5238_v54  ;;  %4352 = vmatpush3.bf16.xpose.msra.mxu1 %v2497_v45 }
 0x22b   : > { %v1089_v30 = vrot.slane %v1081_v20, %v5238_v54  ;;  %v1096_v61 = vrot.slane %v1082_v21, %v5238_v54  ;;  %4353 = vmatprep.mubr.msk.bf16.mxu1 %vm4873_vm0, %v4872_v1  ;;  %4363 = vmatprep.subr.bf16.mxu1 %v4872_v1  ;;  %v2544_v42 = vsel %vm1113_vm1, %v2347_v15, 0  ;;  %v2591_v48 = vsel %vm1113_vm1, %v2348_v41, 0 }
 0x22c   : > { %v965_v32 = vcombine.low %v921_v23, %v953_v60  ;;  %v966_v14 = vcombine.high %v921_v23, %v953_v60  ;;  %v967_v29 = vcombine.low %v928_v24, %v960_v25  ;;  %v968_v19 = vcombine.high %v928_v24, %v960_v25  ;;  %4358 = vmatpush3.bf16.xpose.msra.mxu0 %v2544_v42  ;;  %v1743_v7 = vpop.permute.xlu1 %1742 }
 0x22d   : > { %v1101_v34 = vcombine.low %v1057_v26, %v1089_v30  ;;  %v1102_v35 = vcombine.high %v1057_v26, %v1089_v30  ;;  %v1103_v38 = vcombine.low %v1064_v28, %v1096_v61  ;;  %v1104_v40 = vcombine.high %v1064_v28, %v1096_v61  ;;  %4369 = vmatprep.subr.bf16.mxu0 %v4872_v1 }
 0x22e   : > { %v2638_v58 = vsel %vm1113_vm1, %v2349_v51, 0  ;;  %v2685_v62 = vsel %vm1113_vm1, %v2350_v52, 0  ;;  %v1770_v63 = vcombine.low %v5200_v31, %v1735_v59  ;;  %v1771_v39 = vcombine.high %v5200_v31, %v1735_v59 }
 0x22f   : > { %v1109_v43 = vpack.c.bf16 %v1101_v34, %v965_v32  ;;  %v1110_v44 = vpack.c.bf16 %v1102_v35, %v966_v14  ;;  %v1111_v45 = vpack.c.bf16 %v1103_v38, %v967_v29  ;;  %v1112_v46 = vpack.c.bf16 %v1104_v40, %v968_v19 }
 0x230   : > { %v1906_v11 = vcombine.low %v5204_v33, %v1737_v36  ;;  %v1907_v0 = vcombine.high %v5204_v33, %v1737_v36  ;;  %v1778_v3 = vrot.slane %v1770_v63, %v5232_v47  ;;  %v1786_v4 = vcombine.low %v1729_v50, %v1741_v2 }
 0x231   : > { %1118 = vst.msk [vmem:[#allocation2 + $0x20] sm:$0xff] %vm1113_vm1, %v1109_v43  ;;  %1119 = vst.msk [vmem:[#allocation2 + $0x28] sm:$0xff] %vm1113_vm1, %v1110_v44  ;;  %4354 = vmatmul.mubr.msk.bf16.vlgmr.msra.gmra.mrb[16].mxu1 %vm1113_vm1, %v2338_v49  ;;  %v1787_v5 = vcombine.high %v1729_v50, %v1741_v2  ;;  %v1785_v37 = vrot.slane %v1771_v39, %v5232_v47  ;;  %v1922_v9 = vcombine.low %v1731_v53, %v1743_v7 }
 0x232   : > { %1120 = vst.msk [vmem:[#allocation2 + $0x30] sm:$0xff] %vm1113_vm1, %v1111_v45  ;;  %1121 = vst.msk [vmem:[#allocation2 + $0x38] sm:$0xff] %vm1113_vm1, %v1112_v46  ;;  %4364 = vmatpush3.bf16.xpose.msra.mxu1 %v2591_v48  ;;  %4365 = vmatprep.mubr.msk.bf16.mxu1 %vm4873_vm0, %v4872_v1  ;;  %v1914_v6 = vrot.slane %v1906_v11, %v5232_v47  ;;  %v1921_v31 = vrot.slane %v1907_v0, %v5232_v47 }
 0x233   : > { %4375 = vmatprep.subr.bf16.mxu1 %v4872_v1  ;;  %v1923_v10 = vcombine.high %v1731_v53, %v1743_v7  ;;  %v1794_v12 = vrot.slane %v1786_v4, %v5232_v47  ;;  %v1801_v55 = vrot.slane %v1787_v5, %v5232_v47  ;;  %v1930_v27 = vrot.slane %v1922_v9, %v5232_v47 }
 0x235   : > { %v1937_v16 = vrot.slane %v1923_v10, %v5232_v47  ;;  %v1834_v17 = vcombine.low %v1778_v3, %v1794_v12  ;;  %v1835_v18 = vcombine.high %v1778_v3, %v1794_v12  ;;  %v1850_v20 = vcombine.low %v1785_v37, %v1801_v55 }
 0x236   : > { %v1851_v21 = vcombine.high %v1785_v37, %v1801_v55  ;;  %v1970_v22 = vcombine.low %v1914_v6, %v1930_v27  ;;  %v1971_v23 = vcombine.high %v1914_v6, %v1930_v27 }
 0x237   : > { %v1986_v24 = vcombine.low %v1921_v31, %v1937_v16  ;;  %v1987_v60 = vcombine.high %v1921_v31, %v1937_v16  ;;  %v1842_v25 = vrot.slane %v1834_v17, %v5238_v54  ;;  %v1849_v26 = vrot.slane %v1835_v18, %v5238_v54 }
 0x238   : > { %v2339_v56 = vld [vmem:[#allocation2 + $0x20] sm:$0xff]  ;;  %v2340_v57 = vld [vmem:[#allocation2 + $0x28] sm:$0xff]  ;;  %v1858_v28 = vrot.slane %v1850_v20, %v5238_v54  ;;  %v1865_v30 = vrot.slane %v1851_v21, %v5238_v54  ;;  %v1978_v61 = vrot.slane %v1970_v22, %v5238_v54  ;;  %v1985_v15 = vrot.slane %v1971_v23, %v5238_v54 }
 0x239   : > { %4360 = vmatmul.mubr.msk.bf16.vlgmr.msra.gmra.mrb[4].mxu0 %vm1113_vm1, %v2339_v56  ;;  %4366 = vmatmul.mubr.msk.bf16.vlgmr.msra.gmra.mrb[20].mxu1 %vm1113_vm1, %v2340_v57  ;;  %v2341_v8 = vld [vmem:[#allocation2 + $0x30] sm:$0xff]  ;;  %v2342_v13 = vld [vmem:[#allocation2 + $0x38] sm:$0xff]  ;;  %v1994_v32 = vrot.slane %v1986_v24, %v5238_v54  ;;  %v2001_v14 = vrot.slane %v1987_v60, %v5238_v54  ;;  %v4199_v29 = vcombine.low %v1842_v25, %v1849_v26 }
 0x23a   : > { %4370 = vmatpush3.bf16.xpose.msra.mxu0 %v2638_v58  ;;  %4376 = vmatpush3.bf16.xpose.msra.mxu1 %v2685_v62  ;;  %v4201_v19 = vcombine.high %v1842_v25, %v1849_v26  ;;  %v4203_v34 = vcombine.low %v1858_v28, %v1865_v30  ;;  %v4205_v35 = vcombine.high %v1858_v28, %v1865_v30 }
 0x23b   : > { %4371 = vmatprep.mubr.msk.bf16.mxu0 %vm4873_vm0, %v4872_v1  ;;  %4377 = vmatprep.mubr.msk.bf16.mxu1 %vm4873_vm0, %v4872_v1  ;;  %v4207_v38 = vcombine.low %v1978_v61, %v1985_v15  ;;  %v4209_v40 = vcombine.high %v1978_v61, %v1985_v15  ;;  %v4211_v41 = vcombine.low %v1994_v32, %v2001_v14 }
 0x23c   : > { %4381 = vmatprep.subr.bf16.mxu0 %v4872_v1  ;;  %4387 = vmatprep.subr.bf16.mxu1 %v4872_v1  ;;  %v4213_v42 = vcombine.high %v1994_v32, %v2001_v14  ;;  %v2050_v43 = vrot.slane %v4199_v29, %v5232_v47  ;;  %v2066_v44 = vrot.slane %v4201_v19, %v5232_v47 }
 0x23d   : > { %v2082_v45 = vrot.slane %v4203_v34, %v5232_v47  ;;  %v2098_v46 = vrot.slane %v4205_v35, %v5232_v47  ;;  %v2186_v48 = vrot.slane %v4207_v38, %v5232_v47  ;;  %v2202_v49 = vrot.slane %v4209_v40, %v5232_v47 }
 0x23e   : > { %v2218_v50 = vrot.slane %v4211_v41, %v5232_v47  ;;  %v2234_v51 = vrot.slane %v4213_v42, %v5232_v47  ;;  %v2106_v52 = vcombine.low %v2050_v43, %v2066_v44  ;;  %v2107_v53 = vcombine.high %v2050_v43, %v2066_v44 }
 0x23f   : > { %v2138_v56 = vcombine.low %v2082_v45, %v2098_v46  ;;  %v2139_v57 = vcombine.high %v2082_v45, %v2098_v46  ;;  %v2242_v58 = vcombine.low %v2186_v48, %v2202_v49  ;;  %v2243_v59 = vcombine.high %v2186_v48, %v2202_v49 }
 0x240   : > { %v2274_v62 = vcombine.low %v2218_v50, %v2234_v51  ;;  %v2275_v63 = vcombine.high %v2218_v50, %v2234_v51  ;;  %v2114_v36 = vrot.slane %v2106_v52, %v5238_v54  ;;  %v2121_v39 = vrot.slane %v2107_v53, %v5238_v54 }
 0x241   : > { %4372 = vmatmul.mubr.msk.bf16.vlgmr.msra.gmra.mrb[8].mxu0 %vm1113_vm1, %v2341_v8  ;;  %4378 = vmatmul.mubr.msk.bf16.vlgmr.msra.gmra.mrb[24].mxu1 %vm1113_vm1, %v2342_v13  ;;  %v2146_v11 = vrot.slane %v2138_v56, %v5238_v54  ;;  %v2153_v0 = vrot.slane %v2139_v57, %v5238_v54  ;;  %v2250_v2 = vrot.slane %v2242_v58, %v5238_v54 }
 0x242   : > { %4383 = vmatprep.mubr.msk.bf16.mxu0 %vm4873_vm0, %v4872_v1  ;;  %4389 = vmatprep.mubr.msk.bf16.mxu1 %vm4873_vm0, %v4872_v1  ;;  %v2257_v3 = vrot.slane %v2243_v59, %v5238_v54  ;;  %v2282_v4 = vrot.slane %v2274_v62, %v5238_v54  ;;  %v2289_v5 = vrot.slane %v2275_v63, %v5238_v54 }
 0x243   : > { %v2170_v6 = vcombine.low %v2114_v36, %v2146_v11  ;;  %v2171_v31 = vcombine.high %v2114_v36, %v2146_v11  ;;  %v2172_v37 = vcombine.low %v2121_v39, %v2153_v0  ;;  %v2173_v7 = vcombine.high %v2121_v39, %v2153_v0 }
 0x244   : > { %v2306_v8 = vcombine.low %v2250_v2, %v2282_v4  ;;  %v2307_v9 = vcombine.high %v2250_v2, %v2282_v4  ;;  %v2308_v10 = vcombine.low %v2257_v3, %v2289_v5  ;;  %v2309_v12 = vcombine.high %v2257_v3, %v2289_v5 }
 0x246   : > { %v2314_v55 = vpack.c.bf16 %v2306_v8, %v2170_v6  ;;  %v2315_v13 = vpack.c.bf16 %v2307_v9, %v2171_v31  ;;  %v2316_v27 = vpack.c.bf16 %v2308_v10, %v2172_v37  ;;  %v2317_v16 = vpack.c.bf16 %v2309_v12, %v2173_v7  ;;  %v1747_v31 = vpop.permute.xlu1 %1746  ;;  %v5582_v37 = vpop.permute.xlu0 %1748 }
 0x248   : > { %2322 = vst.msk [vmem:[#allocation4] sm:$0xff] %vm1113_vm1, %v2314_v55  ;;  %2323 = vst.msk [vmem:[#allocation4 + $0x8] sm:$0xff] %vm1113_vm1, %v2315_v13 }
 0x249   : > { %2324 = vst.msk [vmem:[#allocation4 + $0x10] sm:$0xff] %vm1113_vm1, %v2316_v27  ;;  %2325 = vst.msk [vmem:[#allocation4 + $0x18] sm:$0xff] %vm1113_vm1, %v2317_v16 }
 0x24a   : > { %v1753_v7 = vpop.permute.xlu1 %1752  ;;  %v1759_v8 = vpop.permute.xlu0 %1758 }
 0x24e   : > { %v5584_v9 = vpop.permute.xlu1 %1754  ;;  %v1765_v10 = vpop.permute.xlu0 %1764 }
 0x24f   : > { %v2880_v17 = vld [vmem:[#allocation4] sm:$0xff]  ;;  %v2881_v18 = vld [vmem:[#allocation4 + $0x8] sm:$0xff] }
 0x250   : > { %4382 = vmatpush3.bf16.msra.mxu0 %v2880_v17  ;;  %4388 = vmatpush3.bf16.msra.mxu1 %v2881_v18 }
 0x251   : > { %4393 = vmatprep.subr.bf16.mxu0 %v4872_v1  ;;  %4399 = vmatprep.subr.bf16.mxu1 %v4872_v1 }
 0x252   : > { %v5586_v12 = vpop.permute.xlu1 %1760 }
 0x2e4   : > { %v5516_v20 = vpop.f32.mrb[4].mxu1 }
 0x2e5   : > { %v4337_v21 = vpop.f32.mrb[5].mxu1  ;;  %v2728_v22 = vsel %vm1113_vm1, %v5516_v20, -inf }
 0x2e6   : > { %2729 = vmax.xlane.f32.xlu0 %v2728_v22  ;;  %v5520_v23 = vpop.f32.mrb[6].mxu1 }
 0x2e7   : > { %v4338_v24 = vpop.f32.mrb[7].mxu1  ;;  %v2731_v60 = vsel %vm1113_vm1, %v5520_v23, -inf }
 0x2e8   : > { %2732 = vmax.xlane.f32.xlu1 %v2731_v60  ;;  %v1802_v60 = vcombine.low %v1747_v31, %v1759_v8 }
 0x2f4   : > { %v5524_v25 = vpop.f32.mrb[8].mxu1 }
 0x2f5   : > { %v4343_v26 = vpop.f32.mrb[9].mxu1  ;;  %v2734_v28 = vsel %vm1113_vm1, %v5524_v25, -inf }
 0x2f6   : > { %2735 = vmax.xlane.f32.xlu0 %v2734_v28  ;;  %v5528_v30 = vpop.f32.mrb[10].mxu1  ;;  %v1818_v26 = vcombine.low %v1753_v7, %v1765_v10 }
 0x2f7   : > { %v4344_v61 = vpop.f32.mrb[11].mxu1  ;;  %v2737_v15 = vsel %vm1113_vm1, %v5528_v30, -inf }
 0x2fa   : > { %2738 = vmax.xlane.f32.xlu0 %v2737_v15 }
 0x2fc   : > { %v5532_v32 = vpop.f32.mrb[12].mxu1 }
 0x2fd   : > { %v4349_v14 = vpop.f32.mrb[13].mxu1  ;;  %v2740_v29 = vsel %vm1113_vm1, %v5532_v32, -inf }
 0x2fe   : > { %2741 = vmax.xlane.f32.xlu1 %v2740_v29  ;;  %v5536_v19 = vpop.f32.mrb[14].mxu1  ;;  %v1803_v14 = vcombine.high %v1747_v31, %v1759_v8  ;;  %v1819_v29 = vcombine.high %v1753_v7, %v1765_v10  ;;  %v1938_v7 = vcombine.low %v5582_v37, %v5586_v12 }
 0x2ff   : > { %v4350_v34 = vpop.f32.mrb[15].mxu1  ;;  %v2743_v35 = vsel %vm1113_vm1, %v5536_v19, -inf }
 0x300   : > { %2744 = vmax.xlane.f32.xlu0 %v2743_v35  ;;  %v1810_v34 = vrot.slane %v1802_v60, %v5232_v47  ;;  %v1826_v35 = vrot.slane %v1818_v26, %v5232_v47 }
 0x304   : > { %v5540_v38 = vpop.f32.mrb[16].mxu1 }
 0x305   : > { %v4355_v40 = vpop.f32.mrb[17].mxu1  ;;  %v2746_v41 = vsel %vm1113_vm1, %v5540_v38, -inf }
 0x306   : > { %2747 = vmax.xlane.f32.xlu1 %v2746_v41  ;;  %v5544_v42 = vpop.f32.mrb[18].mxu1 }
 0x307   : > { %v4356_v43 = vpop.f32.mrb[19].mxu1  ;;  %v2749_v56 = vsel %vm1113_vm1, %v5544_v42, -inf }
 0x308   : > { %v1817_v43 = vrot.slane %v1803_v14, %v5232_v47 }
 0x30c   : > { %v5546_v44 = vpop.f32.mrb[4].mxu0  ;;  %v5548_v45 = vpop.f32.mrb[20].mxu1 }
 0x30d   : > { %v4361_v46 = vpop.f32.mrb[5].mxu0  ;;  %v2752_v48 = vsel %vm1113_vm1, %v5546_v44, -inf  ;;  %v4367_v49 = vpop.f32.mrb[21].mxu1  ;;  %v2758_v62 = vsel %vm1113_vm1, %v5548_v45, -inf }
 0x30e   : > { %2753 = vmax.xlane.f32.xlu0 %v2752_v48  ;;  %v5552_v50 = vpop.f32.mrb[6].mxu0  ;;  %v5554_v51 = vpop.f32.mrb[22].mxu1  ;;  %v1833_v46 = vrot.slane %v1819_v29, %v5232_v47  ;;  %v1866_v49 = vcombine.low %v1810_v34, %v1826_v35 }
 0x30f   : > { %v4362_v52 = vpop.f32.mrb[7].mxu0  ;;  %v4368_v53 = vpop.f32.mrb[23].mxu1  ;;  %v2761_v2 = vsel %vm1113_vm1, %v5554_v51, -inf  ;;  %v2755_v5 = vsel %vm1113_vm1, %v5552_v50, -inf }
 0x310   : > { %v1867_v52 = vcombine.high %v1810_v34, %v1826_v35 }
 0x312   : > { %2750 = vmax.xlane.f32.xlu0 %v2749_v56 }
 0x314   : > { %v5558_v57 = vpop.f32.mrb[8].mxu0  ;;  %v5560_v58 = vpop.f32.mrb[24].mxu1 }
 0x315   : > { %v4373_v59 = vpop.f32.mrb[9].mxu0  ;;  %v4379_v63 = vpop.f32.mrb[25].mxu1  ;;  %v2770_v6 = vsel %vm1113_vm1, %v5560_v58, -inf }
 0x316   : > { %2759 = vmax.xlane.f32.xlu0 %v2758_v62  ;;  %v5564_v36 = vpop.f32.mrb[10].mxu0  ;;  %v5566_v39 = vpop.f32.mrb[26].mxu1  ;;  %v1882_v59 = vcombine.low %v1817_v43, %v1833_v46  ;;  %v1883_v62 = vcombine.high %v1817_v43, %v1833_v46 }
 0x317   : > { %v4374_v11 = vpop.f32.mrb[11].mxu0  ;;  %1766 = vrot.lane.b32.xlu1 %v5204_v33, %s4880_s22  ;;  %v4380_v0 = vpop.f32.mrb[27].mxu1  ;;  %v2767_v3 = vsel %vm1113_vm1, %v5564_v36, -inf  ;;  %v2773_v4 = vsel %vm1113_vm1, %v5566_v39, -inf  ;;  %v2764_v33 = vsel %vm1113_vm1, %v5558_v57, -inf }
 0x318   : > { %v1874_v0 = vrot.slane %v1866_v49, %v5238_v54 }
 0x31a   : > { %2762 = vmax.xlane.f32.xlu0 %v2761_v2  ;;  %v1881_v2 = vrot.slane %v1867_v52, %v5238_v54 }
 0x31e   : > { %2768 = vmax.xlane.f32.xlu0 %v2767_v3 }
 0x322   : > { %2774 = vmax.xlane.f32.xlu0 %v2773_v4  ;;  %v1890_v4 = vrot.slane %v1882_v59, %v5238_v54 }
 0x33b   : > { %2756 = vmax.xlane.f32.xlu1 %v2755_v5  ;;  %v1897_v5 = vrot.slane %v1883_v62, %v5238_v54 }
 0x33d   : > { %v4206_v8 = vcombine.high %v1890_v4, %v1897_v5 }
 0x33f   : > { %2765 = vmax.xlane.f32.xlu1 %v2764_v33  ;;  %v4200_v33 = vcombine.low %v1874_v0, %v1881_v2  ;;  %v2105_v60 = vrot.slane %v4206_v8, %v5232_v47 }
 0x343   : > { %2771 = vmax.xlane.f32.xlu1 %v2770_v6  ;;  %v4202_v6 = vcombine.high %v1874_v0, %v1881_v2 }
 0x373   : > { %v2730_v55 = vpop.xlane.xlu0 %2729 }
 0x374   : > { %v2776_v13 = vsub.f32 %v5516_v20, %v2730_v55  ;;  %v1939_v55 = vcombine.high %v5582_v37, %v5586_v12  ;;  %v2883_v12 = vld [vmem:[#allocation4 + $0x18] sm:$0xff] }
 0x375   : > { %v2733_v27 = vpop.xlane.xlu1 %2732 }
 0x376   : > { %v2792_v16 = vmul.f32 1.442695, %v2776_v13  ;;  %v2777_v17 = vsub.f32 %v5520_v23, %v2733_v27  ;;  %v2882_v23 = vld [vmem:[#allocation4 + $0x10] sm:$0xff]  ;;  %v2057_v13 = vrot.slane %v4200_v33, %v5232_v47  ;;  %v2073_v27 = vrot.slane %v4202_v6, %v5232_v47 }
 0x377   : > { %v1953_v26 = vrot.slane %v1939_v55, %v5232_v47 }
 0x378   : > { %4626 = vpow2.f32 %v2792_v16  ;;  %v2794_v18 = vmul.f32 1.442695, %v2777_v17 }
 0x37a   : > { %4628 = vpow2.f32 %v2794_v18 }
 0x382   : > { %v4627_v21 = vpop.eup %4626 }
 0x383   : > { %v2824_v22 = vsel %vm1113_vm1, %v4627_v21, 0.0  ;;  %v2736_v28 = vpop.xlane.xlu0 %2735 }
 0x384   : > { %v4629_v24 = vpop.eup %4628  ;;  %2825 = vadd.xlane.f32.xlu1 %v2824_v22  ;;  %v2778_v61 = vsub.f32 %v5524_v25, %v2736_v28  ;;  %v1946_v22 = vrot.slane %v1938_v7, %v5232_v47 }
 0x385   : > { %v2827_v15 = vsel %vm1113_vm1, %v4629_v24, 0.0  ;;  %v2872_v20 = vpack.c.bf16 %v4629_v24, %v4627_v21 }
 0x386   : > { %2828 = vadd.xlane.f32.xlu0 %v2827_v15  ;;  %v2796_v40 = vmul.f32 1.442695, %v2778_v61 }
 0x387   : > { %4384 = vmatmul.mubr.msk.bf16.vlgmr.msra.gmra.mrb[12].mxu0 %vm1113_vm1, %v2872_v20  ;;  %v2739_v41 = vpop.xlane.xlu0 %2738  ;;  %v2122_v20 = vcombine.low %v2057_v13, %v2073_v27 }
 0x388   : > { %4394 = vmatpush3.bf16.msra.mxu0 %v2882_v23  ;;  %4395 = vmatprep.mubr.msk.bf16.mxu0 %vm4873_vm0, %v4872_v1  ;;  %v2779_v25 = vsub.f32 %v5528_v30, %v2739_v41  ;;  %4630 = vpow2.f32 %v2796_v40 }
 0x389   : > { %4405 = vmatprep.subr.bf16.mxu0 %v4872_v1  ;;  %v2130_v0 = vrot.slane %v2122_v20, %v5238_v54 }
 0x38a   : > { %v2798_v48 = vmul.f32 1.442695, %v2779_v25 }
 0x38b   : > { %v2742_v53 = vpop.xlane.xlu1 %2741 }
 0x38c   : > { %4632 = vpow2.f32 %v2798_v48  ;;  %v2780_v56 = vsub.f32 %v5532_v32, %v2742_v53  ;;  %v2123_v53 = vcombine.high %v2057_v13, %v2073_v27 }
 0x38d   : > { %v2745_v63 = vpop.xlane.xlu0 %2744 }
 0x38e   : > { %v2800_v11 = vmul.f32 1.442695, %v2780_v56  ;;  %v2781_v30 = vsub.f32 %v5536_v19, %v2745_v63  ;;  %v4204_v19 = vcombine.low %v1890_v4, %v1897_v5 }
 0x390   : > { %v2802_v3 = vmul.f32 1.442695, %v2781_v30  ;;  %4634 = vpow2.f32 %v2800_v11  ;;  %v2089_v24 = vrot.slane %v4204_v19, %v5232_v47 }
 0x392   : > { %4636 = vpow2.f32 %v2802_v3  ;;  %v5608_v31 = vpop.eup %4630  ;;  %v2154_v40 = vcombine.low %v2089_v24, %v2105_v60  ;;  %v2155_v56 = vcombine.high %v2089_v24, %v2105_v60 }
 0x393   : > { %v2748_v32 = vpop.xlane.xlu1 %2747 }
 0x394   : > { %v2782_v37 = vsub.f32 %v5540_v38, %v2748_v32  ;;  %v2162_v2 = vrot.slane %v2154_v40, %v5238_v54  ;;  %v2137_v32 = vrot.slane %v2123_v53, %v5238_v54  ;;  %v2169_v7 = vrot.slane %v2155_v56, %v5238_v54 }
 0x396   : > { %v5612_v10 = vpop.eup %4632  ;;  %v2804_v41 = vmul.f32 1.442695, %v2782_v37  ;;  %v2175_v37 = vcombine.high %v2130_v0, %v2162_v2 }
 0x397   : > { %v1767_v16 = vpop.permute.xlu1 %1766  ;;  %v2873_v17 = vpack.c.bf16 %v5612_v10, %v5608_v31 }
 0x398   : > { %v1954_v18 = vcombine.low %v5584_v9, %v1767_v16  ;;  %v1955_v21 = vcombine.high %v5584_v9, %v1767_v16  ;;  %v2174_v16 = vcombine.low %v2130_v0, %v2162_v2 }
 0x399   : > { %4390 = vmatmul.mubr.msk.bf16.vlgmr.msra.gmra.mrb[28].mxu1 %vm1113_vm1, %v2873_v17 }
 0x39a   : > { %v1962_v28 = vrot.slane %v1954_v18, %v5232_v47  ;;  %v1969_v61 = vrot.slane %v1955_v21, %v5232_v47  ;;  %4400 = vmatpush3.bf16.msra.mxu1 %v2883_v12  ;;  %4401 = vmatprep.mubr.msk.bf16.mxu1 %vm4873_vm0, %v4872_v1  ;;  %v5632_v9 = vpop.eup %4634  ;;  %v2176_v12 = vcombine.low %v2137_v32, %v2169_v7 }
 0x39b   : > { %v2754_v15 = vpop.xlane.xlu0 %2753  ;;  %4411 = vmatprep.subr.bf16.mxu1 %v4872_v1 }
 0x39c   : > { %v2784_v14 = vsub.f32 %v5546_v44, %v2754_v15  ;;  %v5636_v38 = vpop.eup %4636  ;;  %v2002_v29 = vcombine.low %v1946_v22, %v1962_v28  ;;  %v2003_v23 = vcombine.high %v1946_v22, %v1962_v28  ;;  %v2018_v34 = vcombine.low %v1953_v26, %v1969_v61 }
 0x39d   : > { %v2019_v35 = vcombine.high %v1953_v26, %v1969_v61  ;;  %v2874_v43 = vpack.c.bf16 %v5636_v38, %v5632_v9  ;;  %v2177_v26 = vcombine.high %v2137_v32, %v2169_v7 }
 0x39e   : > { %v2808_v25 = vmul.f32 1.442695, %v2784_v14  ;;  %v2010_v46 = vrot.slane %v2002_v29, %v5238_v54  ;;  %v2017_v48 = vrot.slane %v2003_v23, %v5238_v54  ;;  %v2026_v44 = vrot.slane %v2018_v34, %v5238_v54 }
 0x39f   : > { %v2033_v49 = vrot.slane %v2019_v35, %v5238_v54  ;;  %v2751_v52 = vpop.xlane.xlu0 %2750  ;;  %4396 = vmatmul.mubr.msk.bf16.vlgmr.msra.gmra.mrb[16].mxu0 %vm1113_vm1, %v2874_v43 }
 0x3a0   : > { %4638 = vpow2.f32 %v2808_v25  ;;  %v2783_v59 = vsub.f32 %v5544_v42, %v2751_v52  ;;  %v4208_v62 = vcombine.low %v2010_v46, %v2017_v48  ;;  %v4210_v63 = vcombine.high %v2010_v46, %v2017_v48  ;;  %4407 = vmatprep.mubr.msk.bf16.mxu0 %vm4873_vm0, %v4872_v1 }
 0x3a1   : > { %v4212_v11 = vcombine.low %v2026_v44, %v2033_v49  ;;  %v4214_v30 = vcombine.high %v2026_v44, %v2033_v49  ;;  %4640 = vpow2.f32 %v2804_v41  ;;  %v2830_v46 = vsel %vm1113_vm1, %v5608_v31, 0.0 }
 0x3a2   : > { %v2806_v3 = vmul.f32 1.442695, %v2783_v59  ;;  %v2193_v4 = vrot.slane %v4208_v62, %v5232_v47  ;;  %v2209_v5 = vrot.slane %v4210_v63, %v5232_v47 }
 0x3a3   : > { %v2225_v33 = vrot.slane %v4212_v11, %v5232_v47  ;;  %v2241_v42 = vrot.slane %v4214_v30, %v5232_v47  ;;  %v2760_v6 = vpop.xlane.xlu0 %2759 }
 0x3a4   : > { %4642 = vpow2.f32 %v2806_v3  ;;  %v2786_v19 = vsub.f32 %v5548_v45, %v2760_v6  ;;  %v2258_v8 = vcombine.low %v2193_v4, %v2209_v5  ;;  %v2259_v55 = vcombine.high %v2193_v4, %v2209_v5 }
 0x3a5   : > { %v2290_v13 = vcombine.low %v2225_v33, %v2241_v42  ;;  %v2291_v27 = vcombine.high %v2225_v33, %v2241_v42 }
 0x3a6   : > { %v2812_v17 = vmul.f32 1.442695, %v2786_v19  ;;  %v2266_v18 = vrot.slane %v2258_v8, %v5238_v54  ;;  %v2273_v21 = vrot.slane %v2259_v55, %v5238_v54 }
 0x3a7   : > { %v2298_v22 = vrot.slane %v2290_v13, %v5238_v54  ;;  %v2305_v24 = vrot.slane %v2291_v27, %v5238_v54  ;;  %v2763_v60 = vpop.xlane.xlu0 %2762 }
 0x3a8   : > { %v2787_v45 = vsub.f32 %v5554_v51, %v2763_v60  ;;  %4644 = vpow2.f32 %v2812_v17 }
 0x3a9   : > { %v2310_v28 = vcombine.low %v2266_v18, %v2298_v22  ;;  %v2311_v61 = vcombine.high %v2266_v18, %v2298_v22  ;;  %v2312_v15 = vcombine.low %v2273_v21, %v2305_v24  ;;  %v2313_v20 = vcombine.high %v2273_v21, %v2305_v24 }
 0x3aa   : > { %v4639_v14 = vpop.eup %4638  ;;  %v2814_v29 = vmul.f32 1.442695, %v2787_v45  ;;  %v2839_v21 = vsel %vm1113_vm1, %v5636_v38, 0.0 }
 0x3ab   : > { %v2318_v23 = vpack.c.bf16 %v2310_v28, %v2174_v16  ;;  %v2319_v34 = vpack.c.bf16 %v2311_v61, %v2175_v37  ;;  %v2320_v35 = vpack.c.bf16 %v2312_v15, %v2176_v12  ;;  %v2321_v40 = vpack.c.bf16 %v2313_v20, %v2177_v26  ;;  %v5662_v41 = vpop.eup %4640  ;;  %v2769_v56 = vpop.xlane.xlu0 %2768 }
 0x3ac   : > { %4646 = vpow2.f32 %v2814_v29  ;;  %v2848_v25 = vsel %vm1113_vm1, %v4639_v14, 0.0  ;;  %v2789_v59 = vsub.f32 %v5564_v36, %v2769_v56  ;;  %v2836_v16 = vsel %vm1113_vm1, %v5632_v9, 0.0 }
 0x3ad   : > { %2326 = vst.msk [vmem:[#allocation4 + $0x20] sm:$0xff] %vm1113_vm1, %v2318_v23  ;;  %2327 = vst.msk [vmem:[#allocation4 + $0x28] sm:$0xff] %vm1113_vm1, %v2319_v34  ;;  %2849 = vadd.xlane.f32.xlu1 %v2848_v25 }
 0x3ae   : > { %2328 = vst.msk [vmem:[#allocation4 + $0x30] sm:$0xff] %vm1113_vm1, %v2320_v35  ;;  %2329 = vst.msk [vmem:[#allocation4 + $0x38] sm:$0xff] %vm1113_vm1, %v2321_v40  ;;  %v5669_v51 = vpop.eup %4642  ;;  %v2818_v0 = vmul.f32 1.442695, %v2789_v59 }
 0x3af   : > { %v2875_v43 = vpack.c.bf16 %v5669_v51, %v5662_v41  ;;  %v2775_v63 = vpop.xlane.xlu0 %2774  ;;  %v2845_v22 = vsel %vm1113_vm1, %v5669_v51, 0.0 }
 0x3b0   : > { %v2791_v2 = vsub.f32 %v5566_v39, %v2775_v63 }
 0x3b1   : > { %2831 = vadd.xlane.f32.xlu1 %v2830_v46  ;;  %4402 = vmatmul.mubr.msk.bf16.vlgmr.msra.gmra.mrb[32].mxu1 %vm1113_vm1, %v2875_v43 }
 0x3b2   : > { %4413 = vmatprep.mubr.msk.bf16.mxu1 %vm4873_vm0, %v4872_v1  ;;  %v5678_v48 = vpop.eup %4644  ;;  %v2822_v33 = vmul.f32 1.442695, %v2791_v2 }
 0x3b3   : > { %v2854_v9 = vsel %vm1113_vm1, %v5678_v48, 0.0 }
 0x3b4   : > { %v2884_v44 = vld [vmem:[#allocation4 + $0x20] sm:$0xff]  ;;  %v2885_v49 = vld [vmem:[#allocation4 + $0x28] sm:$0xff] }
 0x3b5   : > { %4406 = vmatpush3.bf16.msra.mxu0 %v2884_v44  ;;  %4412 = vmatpush3.bf16.msra.mxu1 %v2885_v49  ;;  %v2887_v53 = vld [vmem:[#allocation4 + $0x38] sm:$0xff]  ;;  %v2886_v19 = vld [vmem:[#allocation4 + $0x30] sm:$0xff] }
 0x3b6   : > { %v5680_v52 = vpop.eup %4646  ;;  %4423 = vmatprep.subr.bf16.mxu1 %v4872_v1  ;;  %4417 = vmatprep.subr.bf16.mxu0 %v4872_v1 }
 0x3b7   : > { %v2877_v31 = vpack.c.bf16 %v5680_v52, %v5678_v48  ;;  %v2857_v60 = vsel %vm1113_vm1, %v5680_v52, 0.0 }
 0x3b9   : > { %4414 = vmatmul.mubr.msk.bf16.vlgmr.msra.gmra.mrb[36].mxu1 %vm1113_vm1, %v2877_v31 }
 0x3ba   : > { %4424 = vmatpush3.bf16.msra.mxu1 %v2887_v53  ;;  %4425 = vmatprep.mubr.msk.bf16.mxu1 %vm4873_vm0, %v4872_v1 }
 0x3c8   : > { %v2757_v62 = vpop.xlane.xlu1 %2756 }
 0x3c9   : > { %v2785_v11 = vsub.f32 %v5552_v50, %v2757_v62 }
 0x3cb   : > { %v2810_v30 = vmul.f32 1.442695, %v2785_v11 }
 0x3cc   : > { %v2766_v3 = vpop.xlane.xlu1 %2765 }
 0x3cd   : > { %4648 = vpow2.f32 %v2810_v30  ;;  %v2788_v4 = vsub.f32 %v5558_v57, %v2766_v3 }
 0x3ce   : > { %4650 = vpow2.f32 %v2818_v0 }
 0x3cf   : > { %v2816_v5 = vmul.f32 1.442695, %v2788_v4 }
 0x3d0   : > { %v2772_v42 = vpop.xlane.xlu1 %2771 }
 0x3d1   : > { %4652 = vpow2.f32 %v2816_v5  ;;  %v2790_v6 = vsub.f32 %v5560_v58, %v2772_v42  ;;  %v2833_v58 = vsel %vm1113_vm1, %v5612_v10, 0.0  ;;  %v2842_v10 = vsel %vm1113_vm1, %v5662_v41, 0.0 }
 0x3d2   : > { %4654 = vpow2.f32 %v2822_v33 }
 0x3d3   : > { %v2820_v36 = vmul.f32 1.442695, %v2790_v6 }
 0x3d5   : > { %4656 = vpow2.f32 %v2820_v36 }
 0x3d7   : > { %v4649_v32 = vpop.eup %4648 }
 0x3d8   : > { %v2851_v50 = vsel %vm1113_vm1, %v4649_v32, 0.0  ;;  %v2876_v7 = vpack.c.bf16 %v4649_v32, %v4639_v14  ;;  %v4651_v39 = vpop.eup %4650 }
 0x3d9   : > { %2852 = vadd.xlane.f32.xlu0 %v2851_v50  ;;  %v2863_v17 = vsel %vm1113_vm1, %v4651_v39, 0.0 }
 0x3da   : > { %4408 = vmatmul.mubr.msk.bf16.vlgmr.msra.gmra.mrb[20].mxu0 %vm1113_vm1, %v2876_v7 }
 0x3db   : > { %v4653_v57 = vpop.eup %4652  ;;  %4418 = vmatpush3.bf16.msra.mxu0 %v2886_v19  ;;  %4419 = vmatprep.mubr.msk.bf16.mxu0 %vm4873_vm0, %v4872_v1 }
 0x3dc   : > { %v2860_v8 = vsel %vm1113_vm1, %v4653_v57, 0.0  ;;  %v2878_v55 = vpack.c.bf16 %v4651_v39, %v4653_v57  ;;  %4429 = vmatprep.subr.bf16.mxu0 %v4872_v1  ;;  %v4655_v13 = vpop.eup %4654 }
 0x3dd   : > { %2834 = vadd.xlane.f32.xlu0 %v2833_v58  ;;  %2861 = vadd.xlane.f32.xlu1 %v2860_v8  ;;  %v2869_v37 = vsel %vm1113_vm1, %v4655_v13, 0.0 }
 0x3df   : > { %v4657_v27 = vpop.eup %4656 }
 0x3e0   : > { %v2879_v18 = vpack.c.bf16 %v4655_v13, %v4657_v27  ;;  %v2866_v24 = vsel %vm1113_vm1, %v4657_v27, 0.0 }
 0x3e1   : > { %2837 = vadd.xlane.f32.xlu1 %v2836_v16  ;;  %2864 = vadd.xlane.f32.xlu0 %v2863_v17 }
 0x3e2   : > { %4420 = vmatmul.mubr.msk.bf16.vlgmr.msra.gmra.mrb[24].mxu0 %vm1113_vm1, %v2878_v55  ;;  %4426 = vmatmul.mubr.msk.bf16.vlgmr.msra.gmra.mrb[40].mxu1 %vm1113_vm1, %v2879_v18 }
 0x3e3   : > { %4445 = vmatprep.mubr.msk.bf16.mxu0 %vm4873_vm0, %v4872_v1 }
 0x3e5   : > { %2843 = vadd.xlane.f32.xlu1 %v2842_v10  ;;  %2840 = vadd.xlane.f32.xlu0 %v2839_v21 }
 0x3e9   : > { %2855 = vadd.xlane.f32.xlu1 %v2854_v9  ;;  %2846 = vadd.xlane.f32.xlu0 %v2845_v22 }
 0x3ed   : > { %2867 = vadd.xlane.f32.xlu1 %v2866_v24  ;;  %2858 = vadd.xlane.f32.xlu0 %v2857_v60 }
 0x3f1   : > { %2870 = vadd.xlane.f32.xlu0 %v2869_v37 }
 0x411   : > { %v2826_v45 = vpop.xlane.xlu1 %2825 }
 0x412   : > { %4658 = vrcp.f32 %v2826_v45 }
 0x413   : > { %v2829_v15 = vpop.xlane.xlu0 %2828 }
 0x41c   : > { %v4659_v31 = vpop.eup %4658 }
 0x43a   : > { %v5721_v61 = vpop.xlane.xlu1 %2849 }
 0x43e   : > { %v2832_v20 = vpop.xlane.xlu1 %2831 }
 0x45a   : > { %v2925_v38 = vpop.f32.mrb[12].mxu0 }
 0x45b   : > { %v4385_v12 = vpop.f32.mrb[13].mxu0  ;;  %v3256_v59 = vmul.f32 %v4659_v31, %v2925_v38 }
 0x45c   : > { %v2928_v26 = vpop.f32.mrb[14].mxu0 }
 0x45d   : > { %v4386_v28 = vpop.f32.mrb[15].mxu0 }
 0x466   : > { %v5723_v14 = vpop.xlane.xlu0 %2852 }
 0x46a   : > { %v5725_v29 = vpop.xlane.xlu1 %2861  ;;  %v2835_v23 = vpop.xlane.xlu0 %2834 }
 0x46c   : > { %v2969_v34 = vpop.f32.mrb[28].mxu1 }
 0x46d   : > { %v4391_v35 = vpop.f32.mrb[29].mxu1 }
 0x46e   : > { %v2972_v40 = vpop.f32.mrb[30].mxu1  ;;  %v2838_v41 = vpop.xlane.xlu1 %2837 }
 0x46f   : > { %4660 = vrcp.f32 %v2838_v41  ;;  %v5727_v25 = vpop.xlane.xlu0 %2864  ;;  %v4392_v51 = vpop.f32.mrb[31].mxu1 }
 0x470   : > { %4662 = vrcp.f32 %v2829_v15 }
 0x472   : > { %v3013_v43 = vpop.f32.mrb[16].mxu0  ;;  %v2844_v52 = vpop.xlane.xlu1 %2843 }
 0x473   : > { %v2841_v46 = vpop.xlane.xlu0 %2840  ;;  %v4397_v48 = vpop.f32.mrb[17].mxu0 }
 0x474   : > { %4664 = vrcp.f32 %v2841_v46  ;;  %v3016_v44 = vpop.f32.mrb[18].mxu0 }
 0x475   : > { %v4398_v49 = vpop.f32.mrb[19].mxu0  ;;  %4666 = vrcp.f32 %v2832_v20 }
 0x476   : > { %4668 = vrcp.f32 %v2835_v23 }
 0x477   : > { %v2847_v53 = vpop.xlane.xlu0 %2846  ;;  %4670 = vrcp.f32 %v2844_v52 }
 0x478   : > { %4672 = vrcp.f32 %v2847_v53 }
 0x479   : > { %v4661_v56 = vpop.eup %4660  ;;  %4674 = vrcp.f32 %v5721_v61 }
 0x47a   : > { %v3260_v62 = vmul.f32 %v4661_v56, %v3013_v43  ;;  %v4663_v30 = vpop.eup %4662  ;;  %4676 = vrcp.f32 %v5723_v14 }
 0x47b   : > { %v3257_v2 = vmul.f32 %v4663_v30, %v2928_v26  ;;  %4678 = vrcp.f32 %v5725_v29 }
 0x47c   : > { %v3272_v63 = vcombine.low %v3256_v59, %v3260_v62  ;;  %v3273_v11 = vcombine.high %v3256_v59, %v3260_v62 }
 0x47e   : > { %v4665_v0 = vpop.eup %4664  ;;  %v3280_v27 = vrot.slane %v3272_v63, %v5232_v47  ;;  %v3287_v16 = vrot.slane %v3273_v11, %v5232_v47 }
 0x47f   : > { %v3261_v3 = vmul.f32 %v4665_v0, %v3016_v44  ;;  %v4667_v4 = vpop.eup %4666 }
 0x480   : > { %v4669_v42 = vpop.eup %4668  ;;  %v3258_v32 = vmul.f32 %v4667_v4, %v2969_v34 }
 0x481   : > { %v3408_v5 = vcombine.low %v3257_v2, %v3261_v3  ;;  %v3409_v33 = vcombine.high %v3257_v2, %v3261_v3  ;;  %v4671_v6 = vpop.eup %4670  ;;  %v3259_v57 = vmul.f32 %v4669_v42, %v2972_v40 }
 0x482   : > { %v4673_v39 = vpop.eup %4672 }
 0x483   : > { %v3416_v37 = vrot.slane %v3408_v5, %v5232_v47  ;;  %v3423_v38 = vrot.slane %v3409_v33, %v5232_v47  ;;  %v4675_v61 = vpop.eup %4674 }
 0x484   : > { %v3057_v36 = vpop.f32.mrb[32].mxu1 }
 0x485   : > { %v3262_v50 = vmul.f32 %v4671_v6, %v3057_v36  ;;  %v4403_v7 = vpop.f32.mrb[33].mxu1 }
 0x486   : > { %v3060_v19 = vpop.f32.mrb[34].mxu1 }
 0x487   : > { %v3288_v58 = vcombine.low %v3258_v32, %v3262_v50  ;;  %v3289_v8 = vcombine.high %v3258_v32, %v3262_v50  ;;  %v3263_v55 = vmul.f32 %v4673_v39, %v3060_v19  ;;  %v4404_v13 = vpop.f32.mrb[35].mxu1 }
 0x489   : > { %v3296_v17 = vrot.slane %v3288_v58, %v5232_v47  ;;  %v3303_v18 = vrot.slane %v3289_v8, %v5232_v47  ;;  %v3424_v10 = vcombine.low %v3259_v57, %v3263_v55  ;;  %v3425_v21 = vcombine.high %v3259_v57, %v3263_v55 }
 0x48b   : > { %v3336_v9 = vcombine.low %v3280_v27, %v3296_v17  ;;  %v3337_v22 = vcombine.high %v3280_v27, %v3296_v17  ;;  %v3352_v24 = vcombine.low %v3287_v16, %v3303_v18  ;;  %v3353_v60 = vcombine.high %v3287_v16, %v3303_v18  ;;  %v4618_v16 = vld [vmem:[#allocation10] sm:$0xff]  }
 0x48c   : > { %v3432_v12 = vrot.slane %v3424_v10, %v5232_v47  ;;  %v3439_v26 = vrot.slane %v3425_v21, %v5232_v47  ;;  %v5737_v45 = vpop.f32.mrb[36].mxu1  ;;  %4430 = vmatpush3.bf16.msra.mxu0 %v4618_v16 }
 0x48d   : > { %v3344_v28 = vrot.slane %v3336_v9, %v5238_v54  ;;  %v3351_v15 = vrot.slane %v3337_v22, %v5238_v54  ;;  %v3360_v20 = vrot.slane %v3352_v24, %v5238_v54  ;;  %v3367_v23 = vrot.slane %v3353_v60, %v5238_v54  ;;  %v4415_v34 = vpop.f32.mrb[37].mxu1  ;;  %4431 = vmatprep.subr.bf16.mxu0 %v4872_v1 }
 0x48e   : > { %v3472_v35 = vcombine.low %v3416_v37, %v3432_v12  ;;  %v3473_v40 = vcombine.high %v3416_v37, %v3432_v12  ;;  %v3488_v41 = vcombine.low %v3423_v38, %v3439_v26  ;;  %v3489_v51 = vcombine.high %v3423_v38, %v3439_v26  ;;  %v5743_v43 = vpop.f32.mrb[38].mxu1  ;;  %v4619_v37 = vld [vmem:[#allocation10 + $0x8] sm:$0xff]   ;;  %v4620_v34 = vld [vmem:[#allocation10 + $0x10] sm:$0xff]  }
 0x48f   : > { %v4231_v46 = vcombine.low %v3344_v28, %v3351_v15  ;;  %v4233_v48 = vcombine.high %v3344_v28, %v3351_v15  ;;  %v4235_v44 = vcombine.low %v3360_v20, %v3367_v23  ;;  %v4237_v49 = vcombine.high %v3360_v20, %v3367_v23  ;;  %v4416_v52 = vpop.f32.mrb[39].mxu1 }
 0x490   : > { %v3480_v31 = vrot.slane %v3472_v35, %v5238_v54  ;;  %v3487_v53 = vrot.slane %v3473_v40, %v5238_v54  ;;  %v3496_v56 = vrot.slane %v3488_v41, %v5238_v54  ;;  %v3503_v59 = vrot.slane %v3489_v51, %v5238_v54  ;;  %4432 = vmatpush3.bf16.msra.mxu0 %v4619_v37  ;;  %v4621_v35 = vld [vmem:[#allocation10 + $0x18] sm:$0xff]   ;;  %v2856_v40 = vpop.xlane.xlu1 %2855  ;;  %v4622_v41 = vld [vmem:[#allocation10 + $0x20] sm:$0xff]   ;;  %v2859_v51 = vpop.xlane.xlu0 %2858 }
 0x491   : > { %v3552_v62 = vrot.slane %v4231_v46, %v5232_v47  ;;  %v3568_v63 = vrot.slane %v4233_v48, %v5232_v47  ;;  %v3584_v3 = vrot.slane %v4235_v44, %v5232_v47  ;;  %v3600_v4 = vrot.slane %v4237_v49, %v5232_v47  ;;  %4433 = vmatprep.subr.bf16.mxu0 %v4872_v1  ;;  %v4623_v48 = vld [vmem:[#allocation10 + $0x28] sm:$0xff]  }
 0x492   : > { %v4239_v11 = vcombine.low %v3480_v31, %v3487_v53  ;;  %v4241_v30 = vcombine.high %v3480_v31, %v3487_v53  ;;  %v4243_v0 = vcombine.low %v3496_v56, %v3503_v59  ;;  %v4245_v2 = vcombine.high %v3496_v56, %v3503_v59  ;;  %v4677_v31 = vpop.eup %4676 }
 0x493   : > { %v3609_v5 = vcombine.high %v3552_v62, %v3568_v63  ;;  %v3608_v33 = vcombine.low %v3552_v62, %v3568_v63  ;;  %v3641_v7 = vcombine.high %v3584_v3, %v3600_v4  ;;  %v3640_v19 = vcombine.low %v3584_v3, %v3600_v4  ;;  %v4679_v59 = vpop.eup %4678 }
 0x494   : > { %v3688_v42 = vrot.slane %v4239_v11, %v5232_v47  ;;  %v3704_v6 = vrot.slane %v4241_v30, %v5232_v47  ;;  %v3720_v36 = vrot.slane %v4243_v0, %v5232_v47  ;;  %v3736_v32 = vrot.slane %v4245_v2, %v5232_v47  ;;  %4434 = vmatpush3.bf16.msra.mxu0 %v4620_v34  ;;  %v2868_v46 = vpop.xlane.xlu1 %2867  ;;  %v2871_v44 = vpop.xlane.xlu0 %2870 }
 0x495   : > { %v3623_v50 = vrot.slane %v3609_v5, %v5238_v54  ;;  %v5759_v39 = vrot.slane %v3608_v33, %v5238_v54  ;;  %v3655_v13 = vrot.slane %v3641_v7, %v5238_v54  ;;  %v5763_v27 = vrot.slane %v3640_v19, %v5238_v54  ;;  %4435 = vmatprep.subr.bf16.mxu0 %v4872_v1 }
 0x496   : > { %v3745_v57 = vcombine.high %v3688_v42, %v3704_v6  ;;  %v3777_v58 = vcombine.high %v3720_v36, %v3736_v32  ;;  %v3744_v8 = vcombine.low %v3688_v42, %v3704_v6  ;;  %v3776_v55 = vcombine.low %v3720_v36, %v3736_v32 }
 0x497   : > { %v3674_v9 = vcombine.low %v3623_v50, %v3655_v13  ;;  %v3672_v22 = vcombine.low %v5759_v39, %v5763_v27  ;;  %v3673_v24 = vcombine.high %v5759_v39, %v5763_v27  ;;  %v3675_v60 = vcombine.high %v3623_v50, %v3655_v13 }
 0x498   : > { %v3759_v17 = vrot.slane %v3745_v57, %v5238_v54  ;;  %v3791_v18 = vrot.slane %v3777_v58, %v5238_v54  ;;  %v5768_v10 = vrot.slane %v3744_v8, %v5238_v54  ;;  %v5771_v21 = vrot.slane %v3776_v55, %v5238_v54  ;;  %4436 = vmatpush3.bf16.msra.mxu0 %v4621_v35 }
 0x499   : > { %4437 = vmatprep.subr.bf16.mxu0 %v4872_v1  ;;  %4680 = vrcp.f32 %v2856_v40 }
 0x49a   : > { %v3810_v38 = vcombine.low %v3759_v17, %v3791_v18  ;;  %v3809_v12 = vcombine.high %v5768_v10, %v5771_v21  ;;  %v3808_v26 = vcombine.low %v5768_v10, %v5771_v21  ;;  %v3811_v28 = vcombine.high %v3759_v17, %v3791_v18 }
 0x49b   : > { %4682 = vrcp.f32 %v2868_v46 }
 0x49c   : > { %v4555_v15 = vpack.i.bf16 %v3810_v38, %v3674_v9  ;;  %v4550_v20 = vpack.i.bf16 %v3809_v12, %v3673_v24  ;;  %v4560_v23 = vpack.i.bf16 %v3811_v28, %v3675_v60  ;;  %4438 = vmatpush3.bf16.msra.mxu0 %v4622_v41  ;;  %4684 = vrcp.f32 %v5727_v25 }
 0x49d   : > { %4439 = vmatprep.subr.bf16.mxu0 %v4872_v1  ;;  %4686 = vrcp.f32 %v2859_v51 }
 0x49e   : > { %4556 = vrot.lane.b32.xlu0 %v4555_v15, %s4879_s29  ;;  %4551 = vrot.lane.b32.xlu1 %v4550_v20, %s4880_s22  ;;  %4688 = vrcp.f32 %v2871_v44 }
 0x4a0   : > { %4440 = vmatpush3.bf16.msra.mxu0 %v4623_v48 }
 0x4a1   : > { %4441 = vmatprep.subr.bf16.mxu0 %v4872_v1 }
 0x4a2   : > { %4561 = vrot.lane.b32.xlu1 %v4560_v23, %s4878_s21 }
 0x4a3   : > { %v4681_v62 = vpop.eup %4680 }
 0x4a4   : > { %v3266_v25 = vmul.f32 %v4681_v62, %v5737_v45 }
 0x4a5   : > { %v4683_v63 = vpop.eup %4682 }
 0x4a6   : > { %v4685_v0 = vpop.eup %4684 }
 0x4a7   : > { %v4687_v33 = vpop.eup %4686 }
 0x4a8   : > { %v4689_v36 = vpop.eup %4688  ;;  %v3267_v8 = vmul.f32 %v4687_v33, %v5743_v43 }
 0x4ad   : > { %v3101_v49 = vpop.f32.mrb[20].mxu0 }
 0x4ae   : > { %v3264_v14 = vmul.f32 %v4675_v61, %v3101_v49  ;;  %v4409_v52 = vpop.f32.mrb[21].mxu0 }
 0x4af   : > { %v3104_v53 = vpop.f32.mrb[22].mxu0 }
 0x4b0   : > { %v3265_v56 = vmul.f32 %v4677_v31, %v3104_v53  ;;  %v4410_v29 = vpop.f32.mrb[23].mxu0 }
 0x4b5   : > { %v3189_v11 = vpop.f32.mrb[24].mxu0  ;;  %v3233_v30 = vpop.f32.mrb[40].mxu1 }
 0x4b6   : > { %v3268_v2 = vmul.f32 %v4679_v59, %v3189_v11  ;;  %v3270_v3 = vmul.f32 %v4683_v63, %v3233_v30  ;;  %v4421_v4 = vpop.f32.mrb[25].mxu0  ;;  %v4427_v5 = vpop.f32.mrb[41].mxu1 }
 0x4b7   : > { %v3192_v42 = vpop.f32.mrb[26].mxu0  ;;  %v3236_v6 = vpop.f32.mrb[42].mxu1 }
 0x4b8   : > { %v3304_v32 = vcombine.low %v3264_v14, %v3268_v2  ;;  %v3305_v50 = vcombine.high %v3264_v14, %v3268_v2  ;;  %v3320_v7 = vcombine.low %v3266_v25, %v3270_v3  ;;  %v3321_v19 = vcombine.high %v3266_v25, %v3270_v3  ;;  %v4422_v57 = vpop.f32.mrb[27].mxu0  ;;  %v4428_v58 = vpop.f32.mrb[43].mxu1 }
 0x4b9   : > { %v3269_v55 = vmul.f32 %v4685_v0, %v3192_v42  ;;  %v3271_v13 = vmul.f32 %v4689_v36, %v3236_v6 }
 0x4ba   : > { %v3312_v45 = vrot.slane %v3304_v32, %v5232_v47  ;;  %v3319_v16 = vrot.slane %v3305_v50, %v5232_v47  ;;  %v3328_v17 = vrot.slane %v3320_v7, %v5232_v47  ;;  %v3335_v18 = vrot.slane %v3321_v19, %v5232_v47  ;;  %v4624_v7 = vld [vmem:[#allocation10 + $0x30] sm:$0xff]  }
 0x4bb   : > { %v3440_v9 = vcombine.low %v3265_v56, %v3269_v55  ;;  %v3441_v24 = vcombine.high %v3265_v56, %v3269_v55  ;;  %v3456_v60 = vcombine.low %v3267_v8, %v3271_v13  ;;  %v3457_v37 = vcombine.high %v3267_v8, %v3271_v13  ;;  %4442 = vmatpush3.bf16.msra.mxu0 %v4624_v7 }
 0x4bc   : > { %v3368_v38 = vcombine.low %v3312_v45, %v3328_v17  ;;  %v3369_v12 = vcombine.high %v3312_v45, %v3328_v17  ;;  %v3384_v28 = vcombine.low %v3319_v16, %v3335_v18  ;;  %v3385_v15 = vcombine.high %v3319_v16, %v3335_v18  ;;  %4443 = vmatprep.subr.bf16.mxu0 %v4872_v1 }
 0x4bd   : > { %v3448_v43 = vrot.slane %v3440_v9, %v5232_v47  ;;  %v3455_v20 = vrot.slane %v3441_v24, %v5232_v47  ;;  %v3464_v23 = vrot.slane %v3456_v60, %v5232_v47  ;;  %v3471_v34 = vrot.slane %v3457_v37, %v5232_v47 }
 0x4be   : > { %v3376_v35 = vrot.slane %v3368_v38, %v5238_v54  ;;  %v3383_v40 = vrot.slane %v3369_v12, %v5238_v54  ;;  %v3392_v41 = vrot.slane %v3384_v28, %v5238_v54  ;;  %v3399_v51 = vrot.slane %v3385_v15, %v5238_v54  ;;  %v4625_v12 = vld [vmem:[#allocation10 + $0x38] sm:$0xff]  }
 0x4bf   : > { %v3504_v46 = vcombine.low %v3448_v43, %v3464_v23  ;;  %v3505_v48 = vcombine.high %v3448_v43, %v3464_v23  ;;  %v3520_v44 = vcombine.low %v3455_v20, %v3471_v34  ;;  %v3521_v61 = vcombine.high %v3455_v20, %v3471_v34  ;;  %4444 = vmatpush3.bf16.msra.mxu0 %v4625_v12 }
 0x4c0   : > { %v4232_v49 = vcombine.low %v3376_v35, %v3383_v40  ;;  %v4234_v14 = vcombine.high %v3376_v35, %v3383_v40  ;;  %v4236_v52 = vcombine.low %v3392_v41, %v3399_v51  ;;  %v4238_v31 = vcombine.high %v3392_v41, %v3399_v51 }
 0x4c1   : > { %v3512_v53 = vrot.slane %v3504_v46, %v5238_v54  ;;  %v3519_v56 = vrot.slane %v3505_v48, %v5238_v54  ;;  %v3528_v29 = vrot.slane %v3520_v44, %v5238_v54  ;;  %v3535_v59 = vrot.slane %v3521_v61, %v5238_v54 }
 0x4c2   : > { %v3559_v62 = vrot.slane %v4232_v49, %v5232_v47  ;;  %v3575_v63 = vrot.slane %v4234_v14, %v5232_v47  ;;  %v3591_v11 = vrot.slane %v4236_v52, %v5232_v47  ;;  %v3607_v30 = vrot.slane %v4238_v31, %v5232_v47 }
 0x4c3   : > { %v4240_v0 = vcombine.low %v3512_v53, %v3519_v56  ;;  %v4242_v25 = vcombine.high %v3512_v53, %v3519_v56  ;;  %v4244_v2 = vcombine.low %v3528_v29, %v3535_v59  ;;  %v4246_v3 = vcombine.high %v3528_v29, %v3535_v59 }
 0x4c4   : > { %v3624_v4 = vcombine.low %v3559_v62, %v3575_v63  ;;  %v3656_v5 = vcombine.low %v3591_v11, %v3607_v30  ;;  %v3625_v33 = vcombine.high %v3559_v62, %v3575_v63  ;;  %v3657_v42 = vcombine.high %v3591_v11, %v3607_v30 }
 0x4c5   : > { %v3695_v6 = vrot.slane %v4240_v0, %v5232_v47  ;;  %v3711_v36 = vrot.slane %v4242_v25, %v5232_v47  ;;  %v3727_v32 = vrot.slane %v4244_v2, %v5232_v47  ;;  %v3743_v50 = vrot.slane %v4246_v3, %v5232_v47 }
 0x4c6   : > { %v3632_v19 = vrot.slane %v3624_v4, %v5238_v54  ;;  %v3664_v57 = vrot.slane %v3656_v5, %v5238_v54  ;;  %v3639_v58 = vrot.slane %v3625_v33, %v5238_v54  ;;  %v3671_v8 = vrot.slane %v3657_v42, %v5238_v54 }
 0x4c7   : > { %v3760_v55 = vcombine.low %v3695_v6, %v3711_v36  ;;  %v3792_v13 = vcombine.low %v3727_v32, %v3743_v50  ;;  %v3761_v45 = vcombine.high %v3695_v6, %v3711_v36  ;;  %v3793_v16 = vcombine.high %v3727_v32, %v3743_v50  ;;  %v4247_v32 = vld [vmem:[%s5903_s3] ss:$0 sm:$0xff] }
 0x4c8   : > { %v3677_v17 = vcombine.high %v3632_v19, %v3664_v57  ;;  %v3676_v18 = vcombine.low %v3632_v19, %v3664_v57  ;;  %v3679_v9 = vcombine.high %v3639_v58, %v3671_v8  ;;  %v3678_v24 = vcombine.low %v3639_v58, %v3671_v8 }
 0x4c9   : > { %v3768_v47 = vrot.slane %v3760_v55, %v5238_v54  ;;  %v3800_v60 = vrot.slane %v3792_v13, %v5238_v54  ;;  %v3775_v37 = vrot.slane %v3761_v45, %v5238_v54  ;;  %v3807_v38 = vrot.slane %v3793_v16, %v5238_v54 }
 0x4cb   : > { %v3813_v28 = vcombine.high %v3768_v47, %v3800_v60  ;;  %v3812_v15 = vcombine.low %v3768_v47, %v3800_v60  ;;  %v3815_v43 = vcombine.high %v3775_v37, %v3807_v38  ;;  %v3814_v20 = vcombine.low %v3775_v37, %v3807_v38 }
 0x4cd   : > { %v4570_v23 = vpack.i.bf16 %v3813_v28, %v3677_v17  ;;  %v4565_v34 = vpack.i.bf16 %v3812_v15, %v3676_v18  ;;  %v4580_v35 = vpack.i.bf16 %v3815_v43, %v3679_v9  ;;  %v4575_v40 = vpack.i.bf16 %v3814_v20, %v3678_v24 }
 0x4cf   : > { %4571 = vrot.lane.b32.xlu0 %v4570_v23, %s4876_s27  ;;  %4566 = vrot.lane.b32.xlu1 %v4565_v34, %s4877_s14  ;;  %s4883_s27 = smov [#allocation11]  }
 0x4d0   : > { %s4780_s14 = sshll.u32 %s4883_s27, 4  ;;  %s4781_s14 = int_to_ptr.vmem [resolvable:$false] %s4780_s14 }
 0x4d1   : > { %s4782_s21 = scalar_lea.vmem %s4781_s14, 512  ;;  %p4783_p3 = scmp.lt.s32.totalorder %s5846_s13, %s4781_s14 }
 0x4d2   : > { %p4784_p5 = scmp.lt.s32.totalorder %s4782_s21, %s4776_s18 }
 0x4d3   : > { %4581 = vrot.lane.b32.xlu0 %v4580_v35, %s4874_s23  ;;  %4576 = vrot.lane.b32.xlu1 %v4575_v40, %s4875_s25  ;;  %s5851_s23 = scalar_lea.hbm %s5904_s4, %s4262_s12  ;;  %s4008_s25 = scalar_lea.sflag [#allocation7], %s5105_s8 }
 0x4d4   : > { %p4785_p9 = por %p4784_p5, %p4783_p3 }
 0x4d6   : > { %p4786_p11 = pnand %p4785_p9, %p4779_p10 }
 0x510   : > { %v4552_v1 = vpop.permute.xlu1 %4551  ;;  %v4557_v51 = vpop.permute.xlu0 %4556 }
 0x511   : > { %v4554_v54 = vunpack.i.h.bf16 %v4552_v1  ;;  %v4553_v41 = vunpack.i.l.bf16 %v4552_v1  ;;  %v4559_v48 = vunpack.i.h.bf16 %v4557_v51  ;;  %v4558_v44 = vunpack.i.l.bf16 %v4557_v51 }
 0x513   : > { %v3872_v61 = vsel %vm1113_vm1, %v3672_v22, %v4553_v41  ;;  %v3873_v49 = vsel %vm1113_vm1, %v3808_v26, %v4554_v54 }
 0x514   : > { %v4562_v46 = vpop.permute.xlu1 %4561  ;;  %v3876_v56 = vsel %vm3874_vm2, %v3873_v49, %v4559_v48  ;;  %v3875_v29 = vsel %vm3874_vm2, %v3872_v61, %v4558_v44 }
 0x515   : > { %v4564_v14 = vunpack.i.h.bf16 %v4562_v46  ;;  %v4563_v52 = vunpack.i.l.bf16 %v4562_v46 }
 0x517   : > { %v3878_v63 = vsel %vm3877_vm3, %v3875_v29, %v4563_v52  ;;  %v3879_v11 = vsel %vm3877_vm3, %v3876_v56, %v4564_v14 }
 0x541   : > { %v4567_v31 = vpop.permute.xlu1 %4566  ;;  %v4572_v53 = vpop.permute.xlu0 %4571 }
 0x542   : > { %v4569_v59 = vunpack.i.h.bf16 %v4567_v31  ;;  %v4568_v62 = vunpack.i.l.bf16 %v4567_v31  ;;  %v4574_v39 = vunpack.i.h.bf16 %v4572_v53  ;;  %v4573_v27 = vunpack.i.l.bf16 %v4572_v53 }
 0x544   : > { %v3881_v22 = vsel %vm3880_vm4, %v3878_v63, %v4568_v62  ;;  %v3882_v30 = vsel %vm3880_vm4, %v3879_v11, %v4569_v59 }
 0x545   : > { %v4577_v10 = vpop.permute.xlu1 %4576  ;;  %v4582_v21 = vpop.permute.xlu0 %4581  ;;  %v3884_v3 = vsel %vm3883_vm5, %v3881_v22, %v4573_v27  ;;  %v3885_v4 = vsel %vm3883_vm5, %v3882_v30, %v4574_v39 }
 0x546   : > { %v4579_v26 = vunpack.i.h.bf16 %v4577_v10  ;;  %v4578_v0 = vunpack.i.l.bf16 %v4577_v10  ;;  %v4584_v25 = vunpack.i.h.bf16 %v4582_v21  ;;  %v4583_v2 = vunpack.i.l.bf16 %v4582_v21 }
 0x548   : > { %v3887_v5 = vsel %vm3886_vm6, %v3884_v3, %v4578_v0  ;;  %v3888_v33 = vsel %vm3886_vm6, %v3885_v4, %v4579_v26 }
 0x549   : > { %v3890_v42 = vsel %vm3889_vm7, %v3887_v5, %v4583_v2  ;;  %v3891_v6 = vsel %vm3889_vm7, %v3888_v33, %v4584_v25 }
 0x54a   : > { %v3892_v36 = vpack.c.bf16 %v3891_v6, %v3890_v42 }
 0x54c   : > { %4446 = vmatmul.mubr.bf16.vlgmr.msra.gmra.mrb[28].mxu0 %v3892_v36 }
 0x61f   : > { %v3998_v50 = vpop.f32.mrb[28].mxu0 }
 0x620   : > { %v3999_v7 = vadd.f32 %v4247_v32, %v3998_v50  ;;  %v4447_v19 = vpop.f32.mrb[29].mxu0 }
 0x621   : > { %v4001_v57 = vpop.f32.mrb[30].mxu0 }
 0x622   : > { %4005 = vst [vmem:[%s258_s10] sm:$0xff] %v3999_v7  ;;  %v4002_v58 = vadd.f32 %v4247_v32, %v4001_v57  ;;  %v4448_v8 = vpop.f32.mrb[31].mxu0 }
 0x624   : > { %4006 = vst [vmem:[%s258_s10 + $0x8] sm:$0xff] %v4002_v58 }
 0x625   : > { %4789 = shalt.err (!%p4786_p11)
}
 0x626   : > { %s4790_s29 = scalar_lea.hbm %s5851_s23, 256  ;;  %s4794_s7 = scalar_lea.hbm %s5904_s4, 512 }
 0x627   : > { %p4791_p0 = scmp.ne.s32.totalorder %s5851_s23, %s4790_s29  ;;  %p4795_p6 = scmp.lt.u32.totalorder %s5851_s23, %s5904_s4 }
 0x628   : > { %p4796_p7 = scmp.lt.u32.totalorder %s4794_s7, %s4790_s29  ;;  %p4798_p8 = scmp.lt.u32.totalorder %s4790_s29, %s5851_s23 }
 0x629   : > { %p4792_p4 = pnand %p4791_p0, %p5919_p12 }
 0x62a   : > { %p4797_p2 = por %p4796_p7, %p4795_p6 }
 0x62b   : > { %p4793_p13 = pneg %p4792_p4 }
 0x62c   : > { %p4799_p1 = por %p4798_p8, %p4797_p2 }
 0x62e   : > { %p4800_p10 = pnand %p4799_p1, %p4793_p13 }
 0x630   : > { %4803 = shalt.err (!%p4800_p10)
}
 0x631   : > { %s4884_s12 = smov 128   ;;  %s4885_s24 = smov 8  }
 0x632   : > { %4459 = dma.vmem_to_hbm [thread:$0]  (%p5919_p12), %s5846_s13, 256, %s5851_s23, %s4008_s25, %s4884_s12, %s4884_s12, %s4885_s24  }
 0x633 PF: > { %s4038_s9 = sand.u32 1, %s4842_s15   ;;  %p5920_p3 = scmp.ne.s32.totalorder %s5912_s26, 0 }
 0x634   : > { %p5921_p5 = scmp.ge.s32.totalorder %s4862_s20, 2  ;;  %s4039_s18 = scalar_lea.sflag [#allocation7], %s4038_s9 }
 0x636   : > { %p4473_p9 = pnand %p5921_p5, %p5920_p3 }
 0x638   : > { %4837 = dma.done.wait (!%p4473_p9), %s4039_s18, 256  }
 0x639   : > { %4839 = vsyncadd (!%p4473_p9), %s4039_s18, 4294967040  ;;  %s21_s20 = sadd.s32 1, %s4862_s20   ;;  %s5922_s15 = smov %s4846_s16 }
 0x63a   : > { %p18_p11 = scmp.ge.s32.totalorder %s21_s20, 4   ;;  %s5923_s16 = smov %s4850_s17 }
 0x63b   : > { %s5924_s17 = smov %s5056_s11  ;;  %s5925_s18 = smov %s4858_s19 }
 0x63c   : > { %s5926_s19 = smov %s5928_s5  ;;  %20 = sbr.rel (!%p18_p11) target bundleno = 7 (0x7), region = 94 }
 0x643   :  { %4044 = vsyncpa [#allocation6], 1 }
 0x644   :  { %4046 = vsyncpa [#allocation6 + $0x1], 1 }
 0x645   :  { %4047 = vsyncpa [#allocation9], 1 }
 0x646   :  { %4048 = vsyncpa [#allocation7], 1 }
 0x647   :  { %4050 = vsyncpa [#allocation7 + $0x1], 1 }

</bundles_post_ra>
